<compile_context>
chip_gen: v6e
topology: v6e:2x2x1
jax: 0.10.0
libtpu: 0.0.40
codegen_flags: <defaults>
</compile_context>

<pallas_src>
import jax
import jax.numpy as jnp
from jax import lax
from jax.experimental import pallas as pl
from jax.experimental.pallas import tpu as pltpu


# --------------------------- fused model kernel -------------------------------
def make_fused_lstm_kernel(num_layers, T, Bp, H):
    """Kernel: full LSTM stack (wavefronted) + final Linear, single invocation."""

    def kernel(*refs):
        # inputs: x_flat, (w_ih, w_hh, b) * num_layers, w_fc, b_fc
        x_ref = refs[0]
        wrefs = refs[1:1 + 3 * num_layers]
        wfc_ref = refs[1 + 3 * num_layers]
        bfc_ref = refs[2 + 3 * num_layers]
        out_ref = refs[3 + 3 * num_layers]
        gx_scr = refs[4 + 3 * num_layers]        # (T*Bp, 4H) layer-0 input gates

        wih = [wrefs[3 * l + 0][...] for l in range(num_layers)]   # (D_l, 4H)
        whh = [wrefs[3 * l + 1][...] for l in range(num_layers)]   # (H, 4H)
        bias = [wrefs[3 * l + 2][...] for l in range(num_layers)]  # (1, 4H)

        # Hoisted layer-0 input projection: one big GEMM over all timesteps,
        # bias folded in (done once, outside the recurrence).
        gx_scr[...] = (jnp.dot(x_ref[...], wih[0],
                               preferred_element_type=jnp.float32) + bias[0])

        def cell(gates_in, h, c, w_hh_l):
            gates = gates_in + jnp.dot(h, w_hh_l,
                                       preferred_element_type=jnp.float32)
            # Full-width nonlinearities over the whole (Bp, 4H) tile, then slice.
            sig = jax.nn.sigmoid(gates)
            th = jnp.tanh(gates)
            i_g = sig[:, 0 * H:1 * H]
            f_g = sig[:, 1 * H:2 * H]
            o_g = sig[:, 3 * H:4 * H]
            g_g = th[:, 2 * H:3 * H]
            c_new = f_g * c + i_g * g_g
            h_new = o_g * jnp.tanh(c_new)
            return h_new, c_new

        def layer_input(l, s, h_below_old):
            """Input-to-hidden gate contribution for layer l at its wavefront step."""
            if l == 0:
                row = s * Bp
                if not isinstance(row, int):
                    row = pl.multiple_of(row, Bp)    # sublane-aligned offset
                return gx_scr[pl.ds(row, Bp), :]
            # Per-step input projection from the layer below's hidden state.
            return (jnp.dot(h_below_old, wih[l],
                            preferred_element_type=jnp.float32) + bias[l])

        def wave_step(s, state, active):
            # state: tuple of (h, c) per layer; layer l is at timestep (s - l).
            # Every layer reads only OLD h's, so the chains are independent
            # within one step (that's the wavefront occupancy win).
            h_old = [state[l][0] for l in range(num_layers)]
            c_old = [state[l][1] for l in range(num_layers)]
            new_state = []
            for l in range(num_layers):
                if active[l]:
                    gin = layer_input(l, s, h_old[l - 1] if l > 0 else None)
                    h_new, c_new = cell(gin, h_old[l], c_old[l], whh[l])
                    new_state.append((h_new, c_new))
                else:
                    new_state.append((h_old[l], c_old[l]))
            return tuple(new_state)

        zeros = jnp.zeros((Bp, H), jnp.float32)
        state = tuple((zeros, zeros) for _ in range(num_layers))

        # ---- wavefront schedule: pipeline steps s = 0 .. T + L - 2 ------------
        # Prologue (layers fill in) — statically peeled.
        for s in range(min(num_layers - 1, T + num_layers - 1)):
            active = [(l <= s) and (s - l) < T for l in range(num_layers)]
            state = wave_step(s, state, active)

        # Steady state: all layers active (requires T >= num_layers).
        if T >= num_layers:
            all_active = [True] * num_layers
            unroll = True if T <= 16 else 8      # partial unroll for long T
            state = lax.fori_loop(num_layers - 1, T,
                                  lambda s, st: wave_step(s, st, all_active),
                                  state, unroll=unroll)

        # Epilogue (layers drain) — statically peeled.
        for s in range(max(T, num_layers - 1), T + num_layers - 1):
            active = [0 <= (s - l) < T for l in range(num_layers)]
            state = wave_step(s, state, active)

        # Fused final Linear on the last layer's final hidden state.
        h_last = state[num_layers - 1][0]
        out_ref[...] = (jnp.dot(h_last, wfc_ref[...],
                                preferred_element_type=jnp.float32) + bfc_ref[...])

    return kernel


def fused_lstm_forward(x_flat, lstm_params, fc_params, *, T, Bp, H, O):
    """x_flat: (T*Bp, D_in) time-major, batch padded to Bp. Returns (Bp, O)."""
    num_layers = len(lstm_params)
    flat_w = []
    for (w_ih, w_hh, b) in lstm_params:
        flat_w += [w_ih, w_hh, b]
    w_fc_t, b_fc = fc_params
    n_in = 1 + 3 * num_layers + 2

    kernel = make_fused_lstm_kernel(num_layers, T, Bp, H)
    vmem_spec = pl.BlockSpec(memory_space=pltpu.MemorySpace.VMEM)
    # TODO(synk): for production T/H, chunk gx_scr over time and stream per-layer
    # weights (memory_space=pl.ANY + double-buffered make_async_copy, bf16) to
    # stay under v7x's 64 MiB VMEM; unnecessary at these sizes.
    return pl.pallas_call(
        kernel,
        out_shape=jax.ShapeDtypeStruct((Bp, O), jnp.float32),
        in_specs=[vmem_spec] * n_in,
        out_specs=pl.BlockSpec(memory_space=pltpu.MemorySpace.VMEM),
        scratch_shapes=[
            pltpu.VMEM((T * Bp, 4 * H), jnp.float32),   # layer-0 input gates
        ],
    )(x_flat, *flat_w, w_fc_t, b_fc)


# ------------------------------ Model wrapper ---------------------------------
def init_params(key, input_size, hidden_size, num_layers, output_size):
    """PyTorch-style uniform(-1/sqrt(H), 1/sqrt(H)) init, deterministic."""
    k = 1.0 / jnp.sqrt(hidden_size)
    params = {"lstm": [], "fc": None}
    for layer in range(num_layers):
        d_in = input_size if layer == 0 else hidden_size
        key, k1, k2, k3, k4 = jax.random.split(key, 5)
        # Stored transposed for x @ W: (D_in, 4H) and (H, 4H). Gate order [i,f,g,o].
        w_ih = jax.random.uniform(k1, (d_in, 4 * hidden_size), jnp.float32, -k, k)
        w_hh = jax.random.uniform(k2, (hidden_size, 4 * hidden_size), jnp.float32, -k, k)
        b_ih = jax.random.uniform(k3, (4 * hidden_size,), jnp.float32, -k, k)
        b_hh = jax.random.uniform(k4, (4 * hidden_size,), jnp.float32, -k, k)
        b = (b_ih + b_hh).reshape(1, 4 * hidden_size)
        params["lstm"].append((w_ih, w_hh, b))
    key, k5, k6 = jax.random.split(key, 3)
    kf = 1.0 / jnp.sqrt(hidden_size)
    w_fc_t = jax.random.uniform(k5, (hidden_size, output_size), jnp.float32, -kf, kf)
    b_fc = jax.random.uniform(k6, (output_size,), jnp.float32, -kf, kf).reshape(1, output_size)
    params["fc"] = (w_fc_t, b_fc)
    return params


@jax.jit
def lstm_model_forward(x, params):
    """x: (B, T, input_size) batch_first (PyTorch convention). Returns (B, output_size)."""
    B, T, D = x.shape
    H = params["lstm"][0][1].shape[0]
    O = params["fc"][0].shape[1]
    Bp = ((B + 7) // 8) * 8                       # pad batch to a sublane multiple

    x_tm = jnp.transpose(x, (1, 0, 2))            # (T, B, D) time-major
    x_pad = jnp.pad(x_tm, ((0, 0), (0, Bp - B), (0, 0)))
    x_flat = x_pad.reshape(T * Bp, D)             # layout plumbing done in XLA

    out_p = fused_lstm_forward(x_flat, params["lstm"], params["fc"],
                               T=T, Bp=Bp, H=H, O=O)
    return out_p[:B]


# ----------------------------- Pure-JAX reference -----------------------------
def lstm_model_reference(x, params):
    B = x.shape[0]
    h_seq = jnp.transpose(x, (1, 0, 2))
    for (w_ih, w_hh, b) in params["lstm"]:
        H = w_hh.shape[0]
        h = jnp.zeros((B, H), jnp.float32)
        c = jnp.zeros((B, H), jnp.float32)
        outs = []
        for t in range(h_seq.shape[0]):
            gates = h_seq[t] @ w_ih + h @ w_hh + b
            i_g = jax.nn.sigmoid(gates[:, 0 * H:1 * H])
            f_g = jax.nn.sigmoid(gates[:, 1 * H:2 * H])
            g_g = jnp.tanh(gates[:, 2 * H:3 * H])
            o_g = jax.nn.sigmoid(gates[:, 3 * H:4 * H])
            c = f_g * c + i_g * g_g
            h = o_g * jnp.tanh(c)
            outs.append(h)
        h_seq = jnp.stack(outs, axis=0)
    w_fc_t, b_fc = params["fc"]
    return h_seq[-1] @ w_fc_t + b_fc


# ----------------------------------- Main --------------------------------------
if __name__ == "__main__":
    input_size, hidden_size, num_layers, output_size = 16, 32, 2, 4
    B, T = 2, 8

    key = jax.random.PRNGKey(0)
    key, kx, kp = jax.random.split(key, 3)
    x = jax.random.normal(kx, (B, T, input_size), jnp.float32)
    params = init_params(kp, input_size, hidden_size, num_layers, output_size)

    out = lstm_model_forward(x, params)
    out = jax.block_until_ready(out)

    ref = lstm_model_reference(x, params)
    assert out.shape == (B, output_size)
    assert jnp.allclose(out, ref, atol=1e-5, rtol=1e-5), "mismatch vs reference"

    # TODO(synk): training / checkpoint-IO / energy-tracking methods of the
    # PyTorch class are host-side utilities, not kernel work; only forward() is
    # implemented here.
    print("KERNEL_OK")
</pallas_src>

<mosaic_0001>
module attributes {stable_mosaic.version = 11 : i64} {
  func.func @kernel(%arg0: memref<64x16xf32, #tpu.memory_space<vmem>>, %arg1: memref<16x128xf32, #tpu.memory_space<vmem>>, %arg2: memref<32x128xf32, #tpu.memory_space<vmem>>, %arg3: memref<1x128xf32, #tpu.memory_space<vmem>>, %arg4: memref<32x128xf32, #tpu.memory_space<vmem>>, %arg5: memref<32x128xf32, #tpu.memory_space<vmem>>, %arg6: memref<1x128xf32, #tpu.memory_space<vmem>>, %arg7: memref<32x4xf32, #tpu.memory_space<vmem>>, %arg8: memref<1x4xf32, #tpu.memory_space<vmem>>, %arg9: memref<8x4xf32, #tpu.memory_space<vmem>>, %arg10: memref<64x128xf32, #tpu.memory_space<vmem>>) attributes {dimension_semantics = [], scalar_prefetch = 0 : i64, scratch_operands = 1 : i64, tpu.core_type = #tpu.core_type<tc>} {
    %c0 = arith.constant 0 : index
    %c0_0 = arith.constant 0 : index
    %0 = vector.load %arg1[%c0, %c0_0] : memref<16x128xf32, #tpu.memory_space<vmem>>, vector<16x128xf32>
    %c0_1 = arith.constant 0 : index
    %c0_2 = arith.constant 0 : index
    %1 = vector.load %arg4[%c0_1, %c0_2] : memref<32x128xf32, #tpu.memory_space<vmem>>, vector<32x128xf32>
    %c0_3 = arith.constant 0 : index
    %c0_4 = arith.constant 0 : index
    %2 = vector.load %arg2[%c0_3, %c0_4] : memref<32x128xf32, #tpu.memory_space<vmem>>, vector<32x128xf32>
    %c0_5 = arith.constant 0 : index
    %c0_6 = arith.constant 0 : index
    %3 = vector.load %arg5[%c0_5, %c0_6] : memref<32x128xf32, #tpu.memory_space<vmem>>, vector<32x128xf32>
    %c0_7 = arith.constant 0 : index
    %c0_8 = arith.constant 0 : index
    %4 = vector.load %arg3[%c0_7, %c0_8] : memref<1x128xf32, #tpu.memory_space<vmem>>, vector<1x128xf32>
    %c0_9 = arith.constant 0 : index
    %c0_10 = arith.constant 0 : index
    %5 = vector.load %arg6[%c0_9, %c0_10] : memref<1x128xf32, #tpu.memory_space<vmem>>, vector<1x128xf32>
    %c0_11 = arith.constant 0 : index
    %c0_12 = arith.constant 0 : index
    %6 = vector.load %arg0[%c0_11, %c0_12] : memref<64x16xf32, #tpu.memory_space<vmem>>, vector<64x16xf32>
    %cst = arith.constant dense<0.000000e+00> : vector<64x128xf32>
    %7 = tpu.matmul %6, %0, %cst {dimension_numbers = #tpu.dot_dimension_numbers<[1], [0], [0], [1], [0, 0, 1, 1], [], []>} : vector<64x16xf32>, vector<16x128xf32>, vector<64x128xf32> -> vector<64x128xf32>
    %8 = vector.broadcast %4 : vector<1x128xf32> to vector<64x128xf32>
    %9 = arith.addf %7, %8 : vector<64x128xf32>
    %c0_13 = arith.constant 0 : index
    %c0_14 = arith.constant 0 : index
    %10 = vector.load %arg10[%c0_13, %c0_14] : memref<64x128xf32, #tpu.memory_space<vmem>>, vector<64x128xf32>
    tpu.vector_store %arg10[%c0_13, %c0_14], %9 {strides = array<i32>} : memref<64x128xf32, #tpu.memory_space<vmem>>, vector<64x128xf32>,
    %cst_15 = arith.constant 0.000000e+00 : f32
    %11 = vector.broadcast %cst_15 : f32 to vector<8x32xf32>
    %c0_16 = arith.constant 0 : index
    %c0_17 = arith.constant 0 : index
    %12 = vector.load %arg10[%c0_16, %c0_17] : memref<64x128xf32, #tpu.memory_space<vmem>>, vector<8x128xf32>
    %cst_18 = arith.constant dense<0.000000e+00> : vector<8x128xf32>
    %13 = tpu.matmul %11, %2, %cst_18 {dimension_numbers = #tpu.dot_dimension_numbers<[1], [0], [0], [1], [0, 0, 1, 1], [], []>} : vector<8x32xf32>, vector<32x128xf32>, vector<8x128xf32> -> vector<8x128xf32>
    %14 = arith.addf %12, %13 : vector<8x128xf32>
    %15 = arith.negf %14 : vector<8x128xf32>
    %16 = math.exp %15 : vector<8x128xf32>
    %cst_19 = arith.constant 1.000000e+00 : f32
    %17 = vector.broadcast %cst_19 : f32 to vector<8x128xf32>
    %18 = arith.addf %17, %16 : vector<8x128xf32>
    %19 = arith.divf %17, %18 : vector<8x128xf32>
    %20 = math.tanh %14 : vector<8x128xf32>
    %21 = vector.extract_strided_slice %19 {offsets = [0, 0], sizes = [8, 32], strides = [1, 1]} : vector<8x128xf32> to vector<8x32xf32>
    %22 = vector.extract_strided_slice %19 {offsets = [0, 32], sizes = [8, 32], strides = [1, 1]} : vector<8x128xf32> to vector<8x32xf32>
    %23 = vector.extract_strided_slice %19 {offsets = [0, 96], sizes = [8, 32], strides = [1, 1]} : vector<8x128xf32> to vector<8x32xf32>
    %24 = vector.extract_strided_slice %20 {offsets = [0, 64], sizes = [8, 32], strides = [1, 1]} : vector<8x128xf32> to vector<8x32xf32>
    %25 = arith.mulf %22, %11 : vector<8x32xf32>
    %26 = arith.mulf %21, %24 : vector<8x32xf32>
    %27 = arith.addf %25, %26 : vector<8x32xf32>
    %28 = math.tanh %27 : vector<8x32xf32>
    %29 = arith.mulf %23, %28 : vector<8x32xf32>
    %c1_i32 = arith.constant 1 : i32
    %c8_i32 = arith.constant 8 : i32
    %30 = arith.muli %c1_i32, %c8_i32 : i32
    %31 = tpu.assume_multiple %30, 8 : i32
    %32 = arith.index_cast %31 : i32 to index
    %c0_20 = arith.constant 0 : index
    %33 = vector.load %arg10[%32, %c0_20] : memref<64x128xf32, #tpu.memory_space<vmem>>, vector<8x128xf32>
    %cst_21 = arith.constant dense<0.000000e+00> : vector<8x128xf32>
    %34 = tpu.matmul %29, %2, %cst_21 {dimension_numbers = #tpu.dot_dimension_numbers<[1], [0], [0], [1], [0, 0, 1, 1], [], []>} : vector<8x32xf32>, vector<32x128xf32>, vector<8x128xf32> -> vector<8x128xf32>
    %35 = arith.addf %33, %34 : vector<8x128xf32>
    %36 = arith.negf %35 : vector<8x128xf32>
    %37 = math.exp %36 : vector<8x128xf32>
    %cst_22 = arith.constant 1.000000e+00 : f32
    %38 = vector.broadcast %cst_22 : f32 to vector<8x128xf32>
    %39 = arith.addf %38, %37 : vector<8x128xf32>
    %40 = arith.divf %38, %39 : vector<8x128xf32>
    %41 = math.tanh %35 : vector<8x128xf32>
    %42 = vector.extract_strided_slice %40 {offsets = [0, 0], sizes = [8, 32], strides = [1, 1]} : vector<8x128xf32> to vector<8x32xf32>
    %43 = vector.extract_strided_slice %40 {offsets = [0, 32], sizes = [8, 32], strides = [1, 1]} : vector<8x128xf32> to vector<8x32xf32>
    %44 = vector.extract_strided_slice %40 {offsets = [0, 96], sizes = [8, 32], strides = [1, 1]} : vector<8x128xf32> to vector<8x32xf32>
    %45 = vector.extract_strided_slice %41 {offsets = [0, 64], sizes = [8, 32], strides = [1, 1]} : vector<8x128xf32> to vector<8x32xf32>
    %46 = arith.mulf %43, %27 : vector<8x32xf32>
    %47 = arith.mulf %42, %45 : vector<8x32xf32>
    %48 = arith.addf %46, %47 : vector<8x32xf32>
    %49 = math.tanh %48 : vector<8x32xf32>
    %50 = arith.mulf %44, %49 : vector<8x32xf32>
    %cst_23 = arith.constant dense<0.000000e+00> : vector<8x128xf32>
    %51 = tpu.matmul %29, %1, %cst_23 {dimension_numbers = #tpu.dot_dimension_numbers<[1], [0], [0], [1], [0, 0, 1, 1], [], []>} : vector<8x32xf32>, vector<32x128xf32>, vector<8x128xf32> -> vector<8x128xf32>
    %52 = vector.broadcast %5 : vector<1x128xf32> to vector<8x128xf32>
    %53 = arith.addf %51, %52 : vector<8x128xf32>
    %cst_24 = arith.constant dense<0.000000e+00> : vector<8x128xf32>
    %54 = tpu.matmul %11, %3, %cst_24 {dimension_numbers = #tpu.dot_dimension_numbers<[1], [0], [0], [1], [0, 0, 1, 1], [], []>} : vector<8x32xf32>, vector<32x128xf32>, vector<8x128xf32> -> vector<8x128xf32>
    %55 = arith.addf %53, %54 : vector<8x128xf32>
    %56 = arith.negf %55 : vector<8x128xf32>
    %57 = math.exp %56 : vector<8x128xf32>
    %cst_25 = arith.constant 1.000000e+00 : f32
    %58 = vector.broadcast %cst_25 : f32 to vector<8x128xf32>
    %59 = arith.addf %58, %57 : vector<8x128xf32>
    %60 = arith.divf %58, %59 : vector<8x128xf32>
    %61 = math.tanh %55 : vector<8x128xf32>
    %62 = vector.extract_strided_slice %60 {offsets = [0, 0], sizes = [8, 32], strides = [1, 1]} : vector<8x128xf32> to vector<8x32xf32>
    %63 = vector.extract_strided_slice %60 {offsets = [0, 32], sizes = [8, 32], strides = [1, 1]} : vector<8x128xf32> to vector<8x32xf32>
    %64 = vector.extract_strided_slice %60 {offsets = [0, 96], sizes = [8, 32], strides = [1, 1]} : vector<8x128xf32> to vector<8x32xf32>
    %65 = vector.extract_strided_slice %61 {offsets = [0, 64], sizes = [8, 32], strides = [1, 1]} : vector<8x128xf32> to vector<8x32xf32>
    %66 = arith.mulf %63, %11 : vector<8x32xf32>
    %67 = arith.mulf %62, %65 : vector<8x32xf32>
    %68 = arith.addf %66, %67 : vector<8x32xf32>
    %69 = math.tanh %68 : vector<8x32xf32>
    %70 = arith.mulf %64, %69 : vector<8x32xf32>
    %c2_i32 = arith.constant 2 : i32
    %c8_i32_26 = arith.constant 8 : i32
    %71 = arith.muli %c2_i32, %c8_i32_26 : i32
    %72 = tpu.assume_multiple %71, 8 : i32
    %73 = arith.index_cast %72 : i32 to index
    %c0_27 = arith.constant 0 : index
    %74 = vector.load %arg10[%73, %c0_27] : memref<64x128xf32, #tpu.memory_space<vmem>>, vector<8x128xf32>
    %cst_28 = arith.constant dense<0.000000e+00> : vector<8x128xf32>
    %75 = tpu.matmul %50, %2, %cst_28 {dimension_numbers = #tpu.dot_dimension_numbers<[1], [0], [0], [1], [0, 0, 1, 1], [], []>} : vector<8x32xf32>, vector<32x128xf32>, vector<8x128xf32> -> vector<8x128xf32>
    %76 = arith.addf %74, %75 : vector<8x128xf32>
    %77 = arith.negf %76 : vector<8x128xf32>
    %78 = math.exp %77 : vector<8x128xf32>
    %cst_29 = arith.constant 1.000000e+00 : f32
    %79 = vector.broadcast %cst_29 : f32 to vector<8x128xf32>
    %80 = arith.addf %79, %78 : vector<8x128xf32>
    %81 = arith.divf %79, %80 : vector<8x128xf32>
    %82 = math.tanh %76 : vector<8x128xf32>
    %83 = vector.extract_strided_slice %81 {offsets = [0, 0], sizes = [8, 32], strides = [1, 1]} : vector<8x128xf32> to vector<8x32xf32>
    %84 = vector.extract_strided_slice %81 {offsets = [0, 32], sizes = [8, 32], strides = [1, 1]} : vector<8x128xf32> to vector<8x32xf32>
    %85 = vector.extract_strided_slice %81 {offsets = [0, 96], sizes = [8, 32], strides = [1, 1]} : vector<8x128xf32> to vector<8x32xf32>
    %86 = vector.extract_strided_slice %82 {offsets = [0, 64], sizes = [8, 32], strides = [1, 1]} : vector<8x128xf32> to vector<8x32xf32>
    %87 = arith.mulf %84, %48 : vector<8x32xf32>
    %88 = arith.mulf %83, %86 : vector<8x32xf32>
    %89 = arith.addf %87, %88 : vector<8x32xf32>
    %90 = math.tanh %89 : vector<8x32xf32>
    %91 = arith.mulf %85, %90 : vector<8x32xf32>
    %cst_30 = arith.constant dense<0.000000e+00> : vector<8x128xf32>
    %92 = tpu.matmul %50, %1, %cst_30 {dimension_numbers = #tpu.dot_dimension_numbers<[1], [0], [0], [1], [0, 0, 1, 1], [], []>} : vector<8x32xf32>, vector<32x128xf32>, vector<8x128xf32> -> vector<8x128xf32>
    %93 = vector.broadcast %5 : vector<1x128xf32> to vector<8x128xf32>
    %94 = arith.addf %92, %93 : vector<8x128xf32>
    %cst_31 = arith.constant dense<0.000000e+00> : vector<8x128xf32>
    %95 = tpu.matmul %70, %3, %cst_31 {dimension_numbers = #tpu.dot_dimension_numbers<[1], [0], [0], [1], [0, 0, 1, 1], [], []>} : vector<8x32xf32>, vector<32x128xf32>, vector<8x128xf32> -> vector<8x128xf32>
    %96 = arith.addf %94, %95 : vector<8x128xf32>
    %97 = arith.negf %96 : vector<8x128xf32>
    %98 = math.exp %97 : vector<8x128xf32>
    %cst_32 = arith.constant 1.000000e+00 : f32
    %99 = vector.broadcast %cst_32 : f32 to vector<8x128xf32>
    %100 = arith.addf %99, %98 : vector<8x128xf32>
    %101 = arith.divf %99, %100 : vector<8x128xf32>
    %102 = math.tanh %96 : vector<8x128xf32>
    %103 = vector.extract_strided_slice %101 {offsets = [0, 0], sizes = [8, 32], strides = [1, 1]} : vector<8x128xf32> to vector<8x32xf32>
    %104 = vector.extract_strided_slice %101 {offsets = [0, 32], sizes = [8, 32], strides = [1, 1]} : vector<8x128xf32> to vector<8x32xf32>
    %105 = vector.extract_strided_slice %101 {offsets = [0, 96], sizes = [8, 32], strides = [1, 1]} : vector<8x128xf32> to vector<8x32xf32>
    %106 = vector.extract_strided_slice %102 {offsets = [0, 64], sizes = [8, 32], strides = [1, 1]} : vector<8x128xf32> to vector<8x32xf32>
    %107 = arith.mulf %104, %68 : vector<8x32xf32>
    %108 = arith.mulf %103, %106 : vector<8x32xf32>
    %109 = arith.addf %107, %108 : vector<8x32xf32>
    %110 = math.tanh %109 : vector<8x32xf32>
    %111 = arith.mulf %105, %110 : vector<8x32xf32>
    %c3_i32 = arith.constant 3 : i32
    %c8_i32_33 = arith.constant 8 : i32
    %112 = arith.muli %c3_i32, %c8_i32_33 : i32
    %113 = tpu.assume_multiple %112, 8 : i32
    %114 = arith.index_cast %113 : i32 to index
    %c0_34 = arith.constant 0 : index
    %115 = vector.load %arg10[%114, %c0_34] : memref<64x128xf32, #tpu.memory_space<vmem>>, vector<8x128xf32>
    %cst_35 = arith.constant dense<0.000000e+00> : vector<8x128xf32>
    %116 = tpu.matmul %91, %2, %cst_35 {dimension_numbers = #tpu.dot_dimension_numbers<[1], [0], [0], [1], [0, 0, 1, 1], [], []>} : vector<8x32xf32>, vector<32x128xf32>, vector<8x128xf32> -> vector<8x128xf32>
    %117 = arith.addf %115, %116 : vector<8x128xf32>
    %118 = arith.negf %117 : vector<8x128xf32>
    %119 = math.exp %118 : vector<8x128xf32>
    %cst_36 = arith.constant 1.000000e+00 : f32
    %120 = vector.broadcast %cst_36 : f32 to vector<8x128xf32>
    %121 = arith.addf %120, %119 : vector<8x128xf32>
    %122 = arith.divf %120, %121 : vector<8x128xf32>
    %123 = math.tanh %117 : vector<8x128xf32>
    %124 = vector.extract_strided_slice %122 {offsets = [0, 0], sizes = [8, 32], strides = [1, 1]} : vector<8x128xf32> to vector<8x32xf32>
    %125 = vector.extract_strided_slice %122 {offsets = [0, 32], sizes = [8, 32], strides = [1, 1]} : vector<8x128xf32> to vector<8x32xf32>
    %126 = vector.extract_strided_slice %122 {offsets = [0, 96], sizes = [8, 32], strides = [1, 1]} : vector<8x128xf32> to vector<8x32xf32>
    %127 = vector.extract_strided_slice %123 {offsets = [0, 64], sizes = [8, 32], strides = [1, 1]} : vector<8x128xf32> to vector<8x32xf32>
    %128 = arith.mulf %125, %89 : vector<8x32xf32>
    %129 = arith.mulf %124, %127 : vector<8x32xf32>
    %130 = arith.addf %128, %129 : vector<8x32xf32>
    %131 = math.tanh %130 : vector<8x32xf32>
    %132 = arith.mulf %126, %131 : vector<8x32xf32>
    %cst_37 = arith.constant dense<0.000000e+00> : vector<8x128xf32>
    %133 = tpu.matmul %91, %1, %cst_37 {dimension_numbers = #tpu.dot_dimension_numbers<[1], [0], [0], [1], [0, 0, 1, 1], [], []>} : vector<8x32xf32>, vector<32x128xf32>, vector<8x128xf32> -> vector<8x128xf32>
    %134 = vector.broadcast %5 : vector<1x128xf32> to vector<8x128xf32>
    %135 = arith.addf %133, %134 : vector<8x128xf32>
    %cst_38 = arith.constant dense<0.000000e+00> : vector<8x128xf32>
    %136 = tpu.matmul %111, %3, %cst_38 {dimension_numbers = #tpu.dot_dimension_numbers<[1], [0], [0], [1], [0, 0, 1, 1], [], []>} : vector<8x32xf32>, vector<32x128xf32>, vector<8x128xf32> -> vector<8x128xf32>
    %137 = arith.addf %135, %136 : vector<8x128xf32>
    %138 = arith.negf %137 : vector<8x128xf32>
    %139 = math.exp %138 : vector<8x128xf32>
    %cst_39 = arith.constant 1.000000e+00 : f32
    %140 = vector.broadcast %cst_39 : f32 to vector<8x128xf32>
    %141 = arith.addf %140, %139 : vector<8x128xf32>
    %142 = arith.divf %140, %141 : vector<8x128xf32>
    %143 = math.tanh %137 : vector<8x128xf32>
    %144 = vector.extract_strided_slice %142 {offsets = [0, 0], sizes = [8, 32], strides = [1, 1]} : vector<8x128xf32> to vector<8x32xf32>
    %145 = vector.extract_strided_slice %142 {offsets = [0, 32], sizes = [8, 32], strides = [1, 1]} : vector<8x128xf32> to vector<8x32xf32>
    %146 = vector.extract_strided_slice %142 {offsets = [0, 96], sizes = [8, 32], strides = [1, 1]} : vector<8x128xf32> to vector<8x32xf32>
    %147 = vector.extract_strided_slice %143 {offsets = [0, 64], sizes = [8, 32], strides = [1, 1]} : vector<8x128xf32> to vector<8x32xf32>
    %148 = arith.mulf %145, %109 : vector<8x32xf32>
    %149 = arith.mulf %144, %147 : vector<8x32xf32>
    %150 = arith.addf %148, %149 : vector<8x32xf32>
    %151 = math.tanh %150 : vector<8x32xf32>
    %152 = arith.mulf %146, %151 : vector<8x32xf32>
    %c4_i32 = arith.constant 4 : i32
    %c8_i32_40 = arith.constant 8 : i32
    %153 = arith.muli %c4_i32, %c8_i32_40 : i32
    %154 = tpu.assume_multiple %153, 8 : i32
    %155 = arith.index_cast %154 : i32 to index
    %c0_41 = arith.constant 0 : index
    %156 = vector.load %arg10[%155, %c0_41] : memref<64x128xf32, #tpu.memory_space<vmem>>, vector<8x128xf32>
    %cst_42 = arith.constant dense<0.000000e+00> : vector<8x128xf32>
    %157 = tpu.matmul %132, %2, %cst_42 {dimension_numbers = #tpu.dot_dimension_numbers<[1], [0], [0], [1], [0, 0, 1, 1], [], []>} : vector<8x32xf32>, vector<32x128xf32>, vector<8x128xf32> -> vector<8x128xf32>
    %158 = arith.addf %156, %157 : vector<8x128xf32>
    %159 = arith.negf %158 : vector<8x128xf32>
    %160 = math.exp %159 : vector<8x128xf32>
    %cst_43 = arith.constant 1.000000e+00 : f32
    %161 = vector.broadcast %cst_43 : f32 to vector<8x128xf32>
    %162 = arith.addf %161, %160 : vector<8x128xf32>
    %163 = arith.divf %161, %162 : vector<8x128xf32>
    %164 = math.tanh %158 : vector<8x128xf32>
    %165 = vector.extract_strided_slice %163 {offsets = [0, 0], sizes = [8, 32], strides = [1, 1]} : vector<8x128xf32> to vector<8x32xf32>
    %166 = vector.extract_strided_slice %163 {offsets = [0, 32], sizes = [8, 32], strides = [1, 1]} : vector<8x128xf32> to vector<8x32xf32>
    %167 = vector.extract_strided_slice %163 {offsets = [0, 96], sizes = [8, 32], strides = [1, 1]} : vector<8x128xf32> to vector<8x32xf32>
    %168 = vector.extract_strided_slice %164 {offsets = [0, 64], sizes = [8, 32], strides = [1, 1]} : vector<8x128xf32> to vector<8x32xf32>
    %169 = arith.mulf %166, %130 : vector<8x32xf32>
    %170 = arith.mulf %165, %168 : vector<8x32xf32>
    %171 = arith.addf %169, %170 : vector<8x32xf32>
    %172 = math.tanh %171 : vector<8x32xf32>
    %173 = arith.mulf %167, %172 : vector<8x32xf32>
    %cst_44 = arith.constant dense<0.000000e+00> : vector<8x128xf32>
    %174 = tpu.matmul %132, %1, %cst_44 {dimension_numbers = #tpu.dot_dimension_numbers<[1], [0], [0], [1], [0, 0, 1, 1], [], []>} : vector<8x32xf32>, vector<32x128xf32>, vector<8x128xf32> -> vector<8x128xf32>
    %175 = vector.broadcast %5 : vector<1x128xf32> to vector<8x128xf32>
    %176 = arith.addf %174, %175 : vector<8x128xf32>
    %cst_45 = arith.constant dense<0.000000e+00> : vector<8x128xf32>
    %177 = tpu.matmul %152, %3, %cst_45 {dimension_numbers = #tpu.dot_dimension_numbers<[1], [0], [0], [1], [0, 0, 1, 1], [], []>} : vector<8x32xf32>, vector<32x128xf32>, vector<8x128xf32> -> vector<8x128xf32>
    %178 = arith.addf %176, %177 : vector<8x128xf32>
    %179 = arith.negf %178 : vector<8x128xf32>
    %180 = math.exp %179 : vector<8x128xf32>
    %cst_46 = arith.constant 1.000000e+00 : f32
    %181 = vector.broadcast %cst_46 : f32 to vector<8x128xf32>
    %182 = arith.addf %181, %180 : vector<8x128xf32>
    %183 = arith.divf %181, %182 : vector<8x128xf32>
    %184 = math.tanh %178 : vector<8x128xf32>
    %185 = vector.extract_strided_slice %183 {offsets = [0, 0], sizes = [8, 32], strides = [1, 1]} : vector<8x128xf32> to vector<8x32xf32>
    %186 = vector.extract_strided_slice %183 {offsets = [0, 32], sizes = [8, 32], strides = [1, 1]} : vector<8x128xf32> to vector<8x32xf32>
    %187 = vector.extract_strided_slice %183 {offsets = [0, 96], sizes = [8, 32], strides = [1, 1]} : vector<8x128xf32> to vector<8x32xf32>
    %188 = vector.extract_strided_slice %184 {offsets = [0, 64], sizes = [8, 32], strides = [1, 1]} : vector<8x128xf32> to vector<8x32xf32>
    %189 = arith.mulf %186, %150 : vector<8x32xf32>
    %190 = arith.mulf %185, %188 : vector<8x32xf32>
    %191 = arith.addf %189, %190 : vector<8x32xf32>
    %192 = math.tanh %191 : vector<8x32xf32>
    %193 = arith.mulf %187, %192 : vector<8x32xf32>
    %c5_i32 = arith.constant 5 : i32
    %c8_i32_47 = arith.constant 8 : i32
    %194 = arith.muli %c5_i32, %c8_i32_47 : i32
    %195 = tpu.assume_multiple %194, 8 : i32
    %196 = arith.index_cast %195 : i32 to index
    %c0_48 = arith.constant 0 : index
    %197 = vector.load %arg10[%196, %c0_48] : memref<64x128xf32, #tpu.memory_space<vmem>>, vector<8x128xf32>
    %cst_49 = arith.constant dense<0.000000e+00> : vector<8x128xf32>
    %198 = tpu.matmul %173, %2, %cst_49 {dimension_numbers = #tpu.dot_dimension_numbers<[1], [0], [0], [1], [0, 0, 1, 1], [], []>} : vector<8x32xf32>, vector<32x128xf32>, vector<8x128xf32> -> vector<8x128xf32>
    %199 = arith.addf %197, %198 : vector<8x128xf32>
    %200 = arith.negf %199 : vector<8x128xf32>
    %201 = math.exp %200 : vector<8x128xf32>
    %cst_50 = arith.constant 1.000000e+00 : f32
    %202 = vector.broadcast %cst_50 : f32 to vector<8x128xf32>
    %203 = arith.addf %202, %201 : vector<8x128xf32>
    %204 = arith.divf %202, %203 : vector<8x128xf32>
    %205 = math.tanh %199 : vector<8x128xf32>
    %206 = vector.extract_strided_slice %204 {offsets = [0, 0], sizes = [8, 32], strides = [1, 1]} : vector<8x128xf32> to vector<8x32xf32>
    %207 = vector.extract_strided_slice %204 {offsets = [0, 32], sizes = [8, 32], strides = [1, 1]} : vector<8x128xf32> to vector<8x32xf32>
    %208 = vector.extract_strided_slice %204 {offsets = [0, 96], sizes = [8, 32], strides = [1, 1]} : vector<8x128xf32> to vector<8x32xf32>
    %209 = vector.extract_strided_slice %205 {offsets = [0, 64], sizes = [8, 32], strides = [1, 1]} : vector<8x128xf32> to vector<8x32xf32>
    %210 = arith.mulf %207, %171 : vector<8x32xf32>
    %211 = arith.mulf %206, %209 : vector<8x32xf32>
    %212 = arith.addf %210, %211 : vector<8x32xf32>
    %213 = math.tanh %212 : vector<8x32xf32>
    %214 = arith.mulf %208, %213 : vector<8x32xf32>
    %cst_51 = arith.constant dense<0.000000e+00> : vector<8x128xf32>
    %215 = tpu.matmul %173, %1, %cst_51 {dimension_numbers = #tpu.dot_dimension_numbers<[1], [0], [0], [1], [0, 0, 1, 1], [], []>} : vector<8x32xf32>, vector<32x128xf32>, vector<8x128xf32> -> vector<8x128xf32>
    %216 = vector.broadcast %5 : vector<1x128xf32> to vector<8x128xf32>
    %217 = arith.addf %215, %216 : vector<8x128xf32>
    %cst_52 = arith.constant dense<0.000000e+00> : vector<8x128xf32>
    %218 = tpu.matmul %193, %3, %cst_52 {dimension_numbers = #tpu.dot_dimension_numbers<[1], [0], [0], [1], [0, 0, 1, 1], [], []>} : vector<8x32xf32>, vector<32x128xf32>, vector<8x128xf32> -> vector<8x128xf32>
    %219 = arith.addf %217, %218 : vector<8x128xf32>
    %220 = arith.negf %219 : vector<8x128xf32>
    %221 = math.exp %220 : vector<8x128xf32>
    %cst_53 = arith.constant 1.000000e+00 : f32
    %222 = vector.broadcast %cst_53 : f32 to vector<8x128xf32>
    %223 = arith.addf %222, %221 : vector<8x128xf32>
    %224 = arith.divf %222, %223 : vector<8x128xf32>
    %225 = math.tanh %219 : vector<8x128xf32>
    %226 = vector.extract_strided_slice %224 {offsets = [0, 0], sizes = [8, 32], strides = [1, 1]} : vector<8x128xf32> to vector<8x32xf32>
    %227 = vector.extract_strided_slice %224 {offsets = [0, 32], sizes = [8, 32], strides = [1, 1]} : vector<8x128xf32> to vector<8x32xf32>
    %228 = vector.extract_strided_slice %224 {offsets = [0, 96], sizes = [8, 32], strides = [1, 1]} : vector<8x128xf32> to vector<8x32xf32>
    %229 = vector.extract_strided_slice %225 {offsets = [0, 64], sizes = [8, 32], strides = [1, 1]} : vector<8x128xf32> to vector<8x32xf32>
    %230 = arith.mulf %227, %191 : vector<8x32xf32>
    %231 = arith.mulf %226, %229 : vector<8x32xf32>
    %232 = arith.addf %230, %231 : vector<8x32xf32>
    %233 = math.tanh %232 : vector<8x32xf32>
    %234 = arith.mulf %228, %233 : vector<8x32xf32>
    %c6_i32 = arith.constant 6 : i32
    %c8_i32_54 = arith.constant 8 : i32
    %235 = arith.muli %c6_i32, %c8_i32_54 : i32
    %236 = tpu.assume_multiple %235, 8 : i32
    %237 = arith.index_cast %236 : i32 to index
    %c0_55 = arith.constant 0 : index
    %238 = vector.load %arg10[%237, %c0_55] : memref<64x128xf32, #tpu.memory_space<vmem>>, vector<8x128xf32>
    %cst_56 = arith.constant dense<0.000000e+00> : vector<8x128xf32>
    %239 = tpu.matmul %214, %2, %cst_56 {dimension_numbers = #tpu.dot_dimension_numbers<[1], [0], [0], [1], [0, 0, 1, 1], [], []>} : vector<8x32xf32>, vector<32x128xf32>, vector<8x128xf32> -> vector<8x128xf32>
    %240 = arith.addf %238, %239 : vector<8x128xf32>
    %241 = arith.negf %240 : vector<8x128xf32>
    %242 = math.exp %241 : vector<8x128xf32>
    %cst_57 = arith.constant 1.000000e+00 : f32
    %243 = vector.broadcast %cst_57 : f32 to vector<8x128xf32>
    %244 = arith.addf %243, %242 : vector<8x128xf32>
    %245 = arith.divf %243, %244 : vector<8x128xf32>
    %246 = math.tanh %240 : vector<8x128xf32>
    %247 = vector.extract_strided_slice %245 {offsets = [0, 0], sizes = [8, 32], strides = [1, 1]} : vector<8x128xf32> to vector<8x32xf32>
    %248 = vector.extract_strided_slice %245 {offsets = [0, 32], sizes = [8, 32], strides = [1, 1]} : vector<8x128xf32> to vector<8x32xf32>
    %249 = vector.extract_strided_slice %245 {offsets = [0, 96], sizes = [8, 32], strides = [1, 1]} : vector<8x128xf32> to vector<8x32xf32>
    %250 = vector.extract_strided_slice %246 {offsets = [0, 64], sizes = [8, 32], strides = [1, 1]} : vector<8x128xf32> to vector<8x32xf32>
    %251 = arith.mulf %248, %212 : vector<8x32xf32>
    %252 = arith.mulf %247, %250 : vector<8x32xf32>
    %253 = arith.addf %251, %252 : vector<8x32xf32>
    %254 = math.tanh %253 : vector<8x32xf32>
    %255 = arith.mulf %249, %254 : vector<8x32xf32>
    %cst_58 = arith.constant dense<0.000000e+00> : vector<8x128xf32>
    %256 = tpu.matmul %214, %1, %cst_58 {dimension_numbers = #tpu.dot_dimension_numbers<[1], [0], [0], [1], [0, 0, 1, 1], [], []>} : vector<8x32xf32>, vector<32x128xf32>, vector<8x128xf32> -> vector<8x128xf32>
    %257 = vector.broadcast %5 : vector<1x128xf32> to vector<8x128xf32>
    %258 = arith.addf %256, %257 : vector<8x128xf32>
    %cst_59 = arith.constant dense<0.000000e+00> : vector<8x128xf32>
    %259 = tpu.matmul %234, %3, %cst_59 {dimension_numbers = #tpu.dot_dimension_numbers<[1], [0], [0], [1], [0, 0, 1, 1], [], []>} : vector<8x32xf32>, vector<32x128xf32>, vector<8x128xf32> -> vector<8x128xf32>
    %260 = arith.addf %258, %259 : vector<8x128xf32>
    %261 = arith.negf %260 : vector<8x128xf32>
    %262 = math.exp %261 : vector<8x128xf32>
    %cst_60 = arith.constant 1.000000e+00 : f32
    %263 = vector.broadcast %cst_60 : f32 to vector<8x128xf32>
    %264 = arith.addf %263, %262 : vector<8x128xf32>
    %265 = arith.divf %263, %264 : vector<8x128xf32>
    %266 = math.tanh %260 : vector<8x128xf32>
    %267 = vector.extract_strided_slice %265 {offsets = [0, 0], sizes = [8, 32], strides = [1, 1]} : vector<8x128xf32> to vector<8x32xf32>
    %268 = vector.extract_strided_slice %265 {offsets = [0, 32], sizes = [8, 32], strides = [1, 1]} : vector<8x128xf32> to vector<8x32xf32>
    %269 = vector.extract_strided_slice %265 {offsets = [0, 96], sizes = [8, 32], strides = [1, 1]} : vector<8x128xf32> to vector<8x32xf32>
    %270 = vector.extract_strided_slice %266 {offsets = [0, 64], sizes = [8, 32], strides = [1, 1]} : vector<8x128xf32> to vector<8x32xf32>
    %271 = arith.mulf %268, %232 : vector<8x32xf32>
    %272 = arith.mulf %267, %270 : vector<8x32xf32>
    %273 = arith.addf %271, %272 : vector<8x32xf32>
    %274 = math.tanh %273 : vector<8x32xf32>
    %275 = arith.mulf %269, %274 : vector<8x32xf32>
    %c7_i32 = arith.constant 7 : i32
    %c8_i32_61 = arith.constant 8 : i32
    %276 = arith.muli %c7_i32, %c8_i32_61 : i32
    %277 = tpu.assume_multiple %276, 8 : i32
    %278 = arith.index_cast %277 : i32 to index
    %c0_62 = arith.constant 0 : index
    %279 = vector.load %arg10[%278, %c0_62] : memref<64x128xf32, #tpu.memory_space<vmem>>, vector<8x128xf32>
    %cst_63 = arith.constant dense<0.000000e+00> : vector<8x128xf32>
    %280 = tpu.matmul %255, %2, %cst_63 {dimension_numbers = #tpu.dot_dimension_numbers<[1], [0], [0], [1], [0, 0, 1, 1], [], []>} : vector<8x32xf32>, vector<32x128xf32>, vector<8x128xf32> -> vector<8x128xf32>
    %281 = arith.addf %279, %280 : vector<8x128xf32>
    %282 = arith.negf %281 : vector<8x128xf32>
    %283 = math.exp %282 : vector<8x128xf32>
    %cst_64 = arith.constant 1.000000e+00 : f32
    %284 = vector.broadcast %cst_64 : f32 to vector<8x128xf32>
    %285 = arith.addf %284, %283 : vector<8x128xf32>
    %286 = arith.divf %284, %285 : vector<8x128xf32>
    %287 = math.tanh %281 : vector<8x128xf32>
    %288 = vector.extract_strided_slice %286 {offsets = [0, 0], sizes = [8, 32], strides = [1, 1]} : vector<8x128xf32> to vector<8x32xf32>
    %289 = vector.extract_strided_slice %286 {offsets = [0, 32], sizes = [8, 32], strides = [1, 1]} : vector<8x128xf32> to vector<8x32xf32>
    %290 = vector.extract_strided_slice %286 {offsets = [0, 96], sizes = [8, 32], strides = [1, 1]} : vector<8x128xf32> to vector<8x32xf32>
    %291 = vector.extract_strided_slice %287 {offsets = [0, 64], sizes = [8, 32], strides = [1, 1]} : vector<8x128xf32> to vector<8x32xf32>
    %292 = arith.mulf %289, %253 : vector<8x32xf32>
    %293 = arith.mulf %288, %291 : vector<8x32xf32>
    %294 = arith.addf %292, %293 : vector<8x32xf32>
    %295 = math.tanh %294 : vector<8x32xf32>
    %296 = arith.mulf %290, %295 : vector<8x32xf32>
    %cst_65 = arith.constant dense<0.000000e+00> : vector<8x128xf32>
    %297 = tpu.matmul %255, %1, %cst_65 {dimension_numbers = #tpu.dot_dimension_numbers<[1], [0], [0], [1], [0, 0, 1, 1], [], []>} : vector<8x32xf32>, vector<32x128xf32>, vector<8x128xf32> -> vector<8x128xf32>
    %298 = vector.broadcast %5 : vector<1x128xf32> to vector<8x128xf32>
    %299 = arith.addf %297, %298 : vector<8x128xf32>
    %cst_66 = arith.constant dense<0.000000e+00> : vector<8x128xf32>
    %300 = tpu.matmul %275, %3, %cst_66 {dimension_numbers = #tpu.dot_dimension_numbers<[1], [0], [0], [1], [0, 0, 1, 1], [], []>} : vector<8x32xf32>, vector<32x128xf32>, vector<8x128xf32> -> vector<8x128xf32>
    %301 = arith.addf %299, %300 : vector<8x128xf32>
    %302 = arith.negf %301 : vector<8x128xf32>
    %303 = math.exp %302 : vector<8x128xf32>
    %cst_67 = arith.constant 1.000000e+00 : f32
    %304 = vector.broadcast %cst_67 : f32 to vector<8x128xf32>
    %305 = arith.addf %304, %303 : vector<8x128xf32>
    %306 = arith.divf %304, %305 : vector<8x128xf32>
    %307 = math.tanh %301 : vector<8x128xf32>
    %308 = vector.extract_strided_slice %306 {offsets = [0, 0], sizes = [8, 32], strides = [1, 1]} : vector<8x128xf32> to vector<8x32xf32>
    %309 = vector.extract_strided_slice %306 {offsets = [0, 32], sizes = [8, 32], strides = [1, 1]} : vector<8x128xf32> to vector<8x32xf32>
    %310 = vector.extract_strided_slice %306 {offsets = [0, 96], sizes = [8, 32], strides = [1, 1]} : vector<8x128xf32> to vector<8x32xf32>
    %311 = vector.extract_strided_slice %307 {offsets = [0, 64], sizes = [8, 32], strides = [1, 1]} : vector<8x128xf32> to vector<8x32xf32>
    %312 = arith.mulf %309, %273 : vector<8x32xf32>
    %313 = arith.mulf %308, %311 : vector<8x32xf32>
    %314 = arith.addf %312, %313 : vector<8x32xf32>
    %315 = math.tanh %314 : vector<8x32xf32>
    %316 = arith.mulf %310, %315 : vector<8x32xf32>
    %c7_i32_68 = arith.constant 7 : i32
    %cst_69 = arith.constant dense<0.000000e+00> : vector<8x128xf32>
    %317 = tpu.matmul %296, %1, %cst_69 {dimension_numbers = #tpu.dot_dimension_numbers<[1], [0], [0], [1], [0, 0, 1, 1], [], []>} : vector<8x32xf32>, vector<32x128xf32>, vector<8x128xf32> -> vector<8x128xf32>
    %318 = vector.broadcast %5 : vector<1x128xf32> to vector<8x128xf32>
    %319 = arith.addf %317, %318 : vector<8x128xf32>
    %cst_70 = arith.constant dense<0.000000e+00> : vector<8x128xf32>
    %320 = tpu.matmul %316, %3, %cst_70 {dimension_numbers = #tpu.dot_dimension_numbers<[1], [0], [0], [1], [0, 0, 1, 1], [], []>} : vector<8x32xf32>, vector<32x128xf32>, vector<8x128xf32> -> vector<8x128xf32>
    %321 = arith.addf %319, %320 : vector<8x128xf32>
    %322 = arith.negf %321 : vector<8x128xf32>
    %323 = math.exp %322 : vector<8x128xf32>
    %cst_71 = arith.constant 1.000000e+00 : f32
    %324 = vector.broadcast %cst_71 : f32 to vector<8x128xf32>
    %325 = arith.addf %324, %323 : vector<8x128xf32>
    %326 = arith.divf %324, %325 : vector<8x128xf32>
    %327 = math.tanh %321 : vector<8x128xf32>
    %328 = vector.extract_strided_slice %326 {offsets = [0, 0], sizes = [8, 32], strides = [1, 1]} : vector<8x128xf32> to vector<8x32xf32>
    %329 = vector.extract_strided_slice %326 {offsets = [0, 32], sizes = [8, 32], strides = [1, 1]} : vector<8x128xf32> to vector<8x32xf32>
    %330 = vector.extract_strided_slice %326 {offsets = [0, 96], sizes = [8, 32], strides = [1, 1]} : vector<8x128xf32> to vector<8x32xf32>
    %331 = vector.extract_strided_slice %327 {offsets = [0, 64], sizes = [8, 32], strides = [1, 1]} : vector<8x128xf32> to vector<8x32xf32>
    %332 = arith.mulf %329, %314 : vector<8x32xf32>
    %333 = arith.mulf %328, %331 : vector<8x32xf32>
    %334 = arith.addf %332, %333 : vector<8x32xf32>
    %335 = math.tanh %334 : vector<8x32xf32>
    %336 = arith.mulf %330, %335 : vector<8x32xf32>
    %c0_72 = arith.constant 0 : index
    %c0_73 = arith.constant 0 : index
    %337 = vector.load %arg7[%c0_72, %c0_73] : memref<32x4xf32, #tpu.memory_space<vmem>>, vector<32x4xf32>
    %cst_74 = arith.constant dense<0.000000e+00> : vector<8x4xf32>
    %338 = tpu.matmul %336, %337, %cst_74 {dimension_numbers = #tpu.dot_dimension_numbers<[1], [0], [0], [1], [0, 0, 1, 1], [], []>} : vector<8x32xf32>, vector<32x4xf32>, vector<8x4xf32> -> vector<8x4xf32>
    %c0_75 = arith.constant 0 : index
    %c0_76 = arith.constant 0 : index
    %339 = vector.load %arg8[%c0_75, %c0_76] : memref<1x4xf32, #tpu.memory_space<vmem>>, vector<1x4xf32>
    %340 = vector.broadcast %339 : vector<1x4xf32> to vector<8x4xf32>
    %341 = arith.addf %338, %340 : vector<8x4xf32>
    %c0_77 = arith.constant 0 : index
    %c0_78 = arith.constant 0 : index
    %342 = vector.load %arg9[%c0_77, %c0_78] : memref<8x4xf32, #tpu.memory_space<vmem>>, vector<8x4xf32>
    tpu.vector_store %arg9[%c0_77, %c0_78], %341 {strides = array<i32>} : memref<8x4xf32, #tpu.memory_space<vmem>>, vector<8x4xf32>,
    return
  }
}

</mosaic_0001>

<bundles_post_ra>
// kernel: lstm_model_forward.1
= control target key start
LH: loop header
LB: loop body
LE: loop exit
PB: predicated region body
PF: predicated region fallthrough
CT: control target
= control target key end

     0   :  { %v3094_v0 = vmov 0.0   ;;  %vm3095_vm0 = vmmov 0   ;;  %vm62_vm1 = vcmask 130048   ;;  %s3096_s26 = smov 64   ;;  %s3097_s27 = smov 32   ;;  %vm201_vm2 = vcmask 261120   ;;  %s3725_s1 = inlined_call_operand.vmem [shape: f32[16,128], index: 1, kind: input, shape index: {}]   ;;  %s3726_s2 = inlined_call_operand.vmem [shape: f32[32,128], index: 2, kind: input, shape index: {}]   ;;  %s3727_s0 = inlined_call_operand.vmem [shape: f32[64,16], index: 0, kind: input, shape index: {}]   ;;  %s3728_s3 = inlined_call_operand.vmem [shape: f32[1,128], index: 3, kind: input, shape index: {}]   ;;  %s3729_s4 = inlined_call_operand.vmem [shape: f32[32,128], index: 4, kind: input, shape index: {}]   ;;  %s3730_s5 = inlined_call_operand.vmem [shape: f32[32,128], index: 5, kind: input, shape index: {}]   ;;  %s3731_s6 = inlined_call_operand.vmem [shape: f32[1,128], index: 6, kind: input, shape index: {}]   ;;  %s3732_s7 = inlined_call_operand.vmem [shape: f32[32,4], index: 7, kind: input, shape index: {}]   ;;  %s3733_s8 = inlined_call_operand.vmem [shape: f32[1,4], index: 8, kind: input, shape index: {}]   ;;  %s3734_s9 = inlined_call_operand.vmem [shape: f32[8,4], index: 9, kind: output, shape index: {}]  }
   0x1   :  { %2673 = vmatprep.subr.mxu1 %v3094_v0  ;;  %v33_v1 = vld [vmem:[%s3725_s1 + $0x8] sm:$0xff]  ;;  %v3155_v2 = vld [vmem:[%s3726_s2 + $0x18] sm:$0xff]  ;;  %v32_v3 = vld [vmem:[%s3725_s1] sm:$0xff]  ;;  %2681 = vmatprep.mubr.msk.f32.mxu1 %vm3095_vm0, %v3094_v0  ;;  %vm2466_vm3 = vcmask 31744  }
   0x2   :  { %2657 = vmatprep.subr.mxu0 %v33_v1  ;;  %2674 = vmatpush3.msra.mxu1 %v3155_v2  ;;  %v3166_v4 = vld [vmem:[%s3726_s2 + $0x10] sm:$0xff]  ;;  %v48_v5 = vld [vmem:[%s3727_s0] sm:$0xff]  ;;  %v49_v6 = vld [vmem:[%s3727_s0 + $0x8] sm:$0xff] }
   0x3   :  { %2658 = vmatpush3.msra.mxu0 %v33_v1  ;;  %2675 = vmatprep.subr.mxu1 %v3094_v0  ;;  %v3179_v7 = vld [vmem:[%s3726_s2 + $0x8] sm:$0xff]  ;;  %v3187_v8 = vld [vmem:[%s3726_s2] sm:$0xff]  ;;  %v50_v26 = vld [vmem:[%s3727_s0 + $0x10] sm:$0xff] }
   0x4   :  { %2659 = vmatprep.subr.mxu0 %v32_v3  ;;  %2676 = vmatpush3.msra.mxu1 %v3166_v4  ;;  %v3210_v10 = vld [vmem:[%s3728_s3] ss:$0 sm:$0xff]  ;;  %v51_v27 = vld [vmem:[%s3727_s0 + $0x18] sm:$0xff]  ;;  %v3237_v30 = vld [vmem:[%s3729_s4 + $0x10] sm:$0xff] }
   0x5   :  { %2660 = vmatpush3.msra.mxu0 %v32_v3  ;;  %2661 = vmatprep.mubr.msk.f32.mxu0 %vm62_vm1, %v48_v5  ;;  %v52_v28 = vld [vmem:[%s3727_s0 + $0x20] sm:$0xff]  ;;  %v3231_v29 = vld [vmem:[%s3729_s4 + $0x18] sm:$0xff]  ;;  %v53_v31 = vld [vmem:[%s3727_s0 + $0x28] sm:$0xff] }
   0x6   :  { %2677 = vmatprep.subr.mxu1 %v3094_v0  ;;  %2662 = vmatmul.mubr.msk.f32.vlgmr.msra.gmra.mxu0 %vm62_vm1, %v49_v6  ;;  %v54_v32 = vld [vmem:[%s3727_s0 + $0x30] sm:$0xff]  ;;  %v3251_v33 = vld [vmem:[%s3729_s4 + $0x8] sm:$0xff]  ;;  %v3259_v34 = vld [vmem:[%s3729_s4] sm:$0xff] }
   0x7   :  { %2678 = vmatpush3.msra.mxu1 %v3179_v7  ;;  %2695 = vmatprep.subr.mxu0 %v3094_v0  ;;  %v55_v35 = vld [vmem:[%s3727_s0 + $0x38] sm:$0xff]  ;;  %v3284_v41 = vld [vmem:[%s3730_s5 + $0x10] sm:$0xff]  ;;  %v3293_v42 = vld [vmem:[%s3730_s5 + $0x8] sm:$0xff] }
   0x8   :  { %2679 = vmatprep.subr.mxu1 %v3094_v0  ;;  %2664 = vmatprep.mubr.msk.f32.mxu0 %vm62_vm1, %v50_v26  ;;  %v3277_v39 = vld [vmem:[%s3730_s5 + $0x18] sm:$0xff]  ;;  %v3302_v43 = vld [vmem:[%s3730_s5] sm:$0xff] }
   0x9   :  { %2680 = vmatpush3.msra.mxu1 %v3187_v8  ;;  %2696 = vmatpush3.msra.mxu0 %v3231_v29  ;;  %v3344_v56 = vld [vmem:[%s3731_s6] ss:$0 sm:$0xff] }
   0xa   :  { %2682 = vmatmul.mubr.f32.vlgmr.msra.gmra.mxu1 %v3094_v0  ;;  %2684 = vmatprep.subr.mxu1 %v3094_v0 }
   0xb   :  { %2685 = vmatpush3.msra.mxu1 %v3155_v2  ;;  %2692 = vmatprep.mubr.msk.f32.mxu1 %vm3095_vm0, %v3094_v0 }
   0xc   :  { %2686 = vmatprep.subr.mxu1 %v3094_v0  ;;  %2665 = vmatmul.mubr.msk.f32.gmra.mxu0 %vm62_vm1, %v51_v27 }
   0xd   :  { %2687 = vmatpush3.msra.mxu1 %v3166_v4  ;;  %2667 = vmatprep.mubr.msk.f32.mxu0 %vm62_vm1, %v52_v28 }
   0xe   :  { %2688 = vmatprep.subr.mxu1 %v3094_v0  ;;  %2697 = vmatprep.subr.mxu0 %v3094_v0 }
   0xf   :  { %2689 = vmatpush3.msra.mxu1 %v3179_v7  ;;  %2698 = vmatpush3.msra.mxu0 %v3237_v30 }
  0x10   :  { %2690 = vmatprep.subr.mxu1 %v3094_v0  ;;  %2668 = vmatmul.mubr.msk.f32.gmra.mxu0 %vm62_vm1, %v53_v31 }
  0x11   :  { %2691 = vmatpush3.msra.mxu1 %v3187_v8  ;;  %2699 = vmatprep.subr.mxu0 %v3094_v0 }
  0x12   :  { %2706 = vmatprep.subr.mxu1 %v3094_v0  ;;  %2670 = vmatprep.mubr.msk.f32.mxu0 %vm62_vm1, %v54_v32 }
  0x13   :  { %2700 = vmatpush3.msra.mxu0 %v3251_v33 }
  0x14   :  { %2701 = vmatprep.subr.mxu0 %v3094_v0  ;;  %2671 = vmatmul.mubr.msk.f32.gmra.mxu0 %vm62_vm1, %v55_v35 }
  0x15   :  { %2702 = vmatpush3.msra.mxu0 %v3259_v34  ;;  %2703 = vmatprep.mubr.msk.f32.mxu0 %vm3095_vm0, %v3094_v0 }
  0x16   :  { %2717 = vmatprep.subr.mxu0 %v3094_v0 }
  0xc6   :  { %v3205_v9 = vpop.f32.mrf.mxu0 }
  0xc7   :  { %v159_v50 = vadd.f32 %v3205_v9, %v3210_v10 }
  0xc8   :  { %v153_v11 = vpop.f32.mrf.mxu0 }
  0xc9   :  { %v154_v12 = vadd.f32 %v3210_v10, %v153_v11 }
  0xca   :  { %v271_v13 = vpop.f32.mrf.mxu1 }
  0xcb   :  { %v275_v14 = vadd.f32 %v271_v13, %v154_v12 }
  0xcc   :  { %v2683_v15 = vpop.f32.mrf.mxu1  ;;  %v3327_v44 = vpop.f32.mrf.mxu0 }
  0xcd   :  { %2952 = vtanh.f32 %v275_v14  ;;  %v2481_v17 = vmul.f32 -1.442695, %v275_v14 }
  0xce   :  { %v3329_v45 = vpop.f32.mrf.mxu0 }
  0xcf   :  { %2954 = vpow2.f32 %v2481_v17  ;;  %v164_v35 = vadd.f32 %v3210_v10, %v3329_v45 }
  0xd0   :  { %v3331_v46 = vpop.f32.mrf.mxu0 }
  0xd2   :  { %v3333_v47 = vpop.f32.mrf.mxu0 }
  0xd4   :  { %v3335_v48 = vpop.f32.mrf.mxu0 }
  0xd6   :  { %v3337_v49 = vpop.f32.mrf.mxu0 }
  0xda   :  { %v2953_v16 = vpop.eup %2952 }
  0xdb   :  { %285 = vrot.lane.b32.xlu0 %v2953_v16, %s3096_s26 }
  0xdc   :  { %v2955_v18 = vpop.eup %2954 }
  0xdd   :  { %v279_v19 = vadd.f32 1.0, %v2955_v18 }
  0xdf   :  { %2956 = vrcp.f32 %v279_v19 }
  0xec   :  { %v2957_v20 = vpop.eup %2956 }
  0xed   :  { %v283_v23 = vmul.f32 0.0, %v2957_v20 }
 0x14d   :  { %v286_v21 = vpop.permute.xlu0 %285 }
 0x14e   :  { %v288_v22 = vmul.f32 %v2957_v20, %v286_v21 }
 0x150   :  { %290 = vrot.lane.b32.xlu0 %v288_v22, %s3097_s27 }
 0x1c2   :  { %v291_v24 = vpop.permute.xlu0 %290 }
 0x1c3   :  { %v3215_v25 = vadd.f32 %v291_v24, %v283_v23 }
 0x1c5   :  { %2958 = vtanh.f32 %v3215_v25 }
 0x1d2   :  { %v2959_v36 = vpop.eup %2958 }
 0x1d3   :  { %296 = vrot.lane.b32.xlu1 %v2959_v36, %s3096_s26 }
 0x245   :  { %v297_v37 = vpop.permute.xlu1 %296 }
 0x246   :  { %v299_v38 = vmul.f32 %v2957_v20, %v297_v37 }
 0x248   :  { %303 = vrot.lane.b32.xlu1 %v299_v38, %s3097_s27 }
 0x2ba   :  { %v304_v40 = vpop.permute.xlu1 %303 }
 0x2bb   :  { %2693 = vmatmul.mubr.msk.f32.vlgmr.msra.gmra.mxu1 %vm201_vm2, %v304_v40  ;;  %2704 = vmatmul.mubr.msk.f32.vlgmr.msra.gmra.mxu0 %vm201_vm2, %v304_v40 }
 0x2bc   :  { %2707 = vmatpush3.msra.mxu1 %v3277_v39  ;;  %2714 = vmatprep.mubr.msk.f32.mxu1 %vm3095_vm0, %v3094_v0 }
 0x2bd   :  { %2708 = vmatprep.subr.mxu1 %v3094_v0  ;;  %2718 = vmatpush3.msra.mxu0 %v3155_v2 }
 0x2be   :  { %2709 = vmatpush3.msra.mxu1 %v3284_v41  ;;  %2719 = vmatprep.subr.mxu0 %v3094_v0 }
 0x2bf   :  { %2710 = vmatprep.subr.mxu1 %v3094_v0  ;;  %2720 = vmatpush3.msra.mxu0 %v3166_v4 }
 0x2c0   :  { %2711 = vmatpush3.msra.mxu1 %v3293_v42  ;;  %2721 = vmatprep.subr.mxu0 %v3094_v0 }
 0x2c1   :  { %2712 = vmatprep.subr.mxu1 %v3094_v0  ;;  %2722 = vmatpush3.msra.mxu0 %v3179_v7 }
 0x2c2   :  { %2713 = vmatpush3.msra.mxu1 %v3302_v43  ;;  %2723 = vmatprep.subr.mxu0 %v3094_v0 }
 0x2c3   :  { %2715 = vmatmul.mubr.f32.vlgmr.msra.gmra.mxu1 %v3094_v0  ;;  %2728 = vmatprep.subr.mxu1 %v3094_v0 }
 0x2c4   :  { %2729 = vmatpush3.msra.mxu1 %v3231_v29  ;;  %2724 = vmatpush3.msra.mxu0 %v3187_v8 }
 0x2c5   :  { %2730 = vmatprep.subr.mxu1 %v3094_v0  ;;  %2725 = vmatprep.mubr.msk.f32.mxu0 %vm3095_vm0, %v3094_v0 }
 0x2c6   :  { %2731 = vmatpush3.msra.mxu1 %v3237_v30  ;;  %2736 = vmatprep.mubr.msk.f32.mxu1 %vm3095_vm0, %v3094_v0 }
 0x2c7   :  { %2732 = vmatprep.subr.mxu1 %v3094_v0  ;;  %2739 = vmatprep.subr.mxu0 %v3094_v0 }
 0x2c8   :  { %2733 = vmatpush3.msra.mxu1 %v3251_v33 }
 0x2c9   :  { %2734 = vmatprep.subr.mxu1 %v3094_v0 }
 0x2ca   :  { %2735 = vmatpush3.msra.mxu1 %v3259_v34 }
 0x2cb   :  { %2750 = vmatprep.subr.mxu1 %v3094_v0 }
 0x37b   :  { %v373_v51 = vpop.f32.mrf.mxu1  ;;  %v474_v52 = vpop.f32.mrf.mxu0 }
 0x37c   :  { %v377_v53 = vadd.f32 %v373_v51, %v159_v50  ;;  %v475_v57 = vadd.f32 %v3344_v56, %v474_v52 }
 0x37d   :  { %v2694_v54 = vpop.f32.mrf.mxu1  ;;  %v2705_v55 = vpop.f32.mrf.mxu0 }
 0x37e   :  { %2960 = vtanh.f32 %v377_v53  ;;  %v2483_v63 = vmul.f32 -1.442695, %v377_v53 }
 0x383   :  { %v544_v58 = vpop.f32.mrf.mxu1 }
 0x384   :  { %v548_v59 = vadd.f32 %v544_v58, %v475_v57 }
 0x385   :  { %v2716_v60 = vpop.f32.mrf.mxu1 }
 0x386   :  { %2962 = vtanh.f32 %v548_v59  ;;  %v2486_v1 = vmul.f32 -1.442695, %v548_v59 }
 0x387   :  { %2964 = vpow2.f32 %v2483_v63 }
 0x388   :  { %2966 = vpow2.f32 %v2486_v1 }
 0x38b   :  { %v2961_v61 = vpop.eup %2960 }
 0x38c   :  { %387 = vrot.lane.b32.xlu0 %v2961_v61, %s3096_s26 }
 0x393   :  { %v2963_v62 = vpop.eup %2962 }
 0x394   :  { %558 = vrot.lane.b32.xlu1 %v2963_v62, %s3096_s26  ;;  %v2965_v3 = vpop.eup %2964 }
 0x395   :  { %v381_v5 = vadd.f32 1.0, %v2965_v3  ;;  %v2967_v6 = vpop.eup %2966 }
 0x396   :  { %v552_v9 = vadd.f32 1.0, %v2967_v6 }
 0x397   :  { %2968 = vrcp.f32 %v381_v5 }
 0x398   :  { %2970 = vrcp.f32 %v552_v9 }
 0x3a4   :  { %v2969_v11 = vpop.eup %2968 }
 0x3a5   :  { %v2971_v14 = vpop.eup %2970  ;;  %v385_v17 = vmul.f32 %v2969_v11, %v3215_v25 }
 0x3a6   :  { %v556_v20 = vmul.f32 0.0, %v2971_v14 }
 0x3fe   :  { %v388_v12 = vpop.permute.xlu0 %387 }
 0x3ff   :  { %v390_v13 = vmul.f32 %v2969_v11, %v388_v12 }
 0x401   :  { %392 = vrot.lane.b32.xlu0 %v390_v13, %s3097_s27 }
 0x406   :  { %v559_v15 = vpop.permute.xlu1 %558 }
 0x407   :  { %v561_v16 = vmul.f32 %v2971_v14, %v559_v15 }
 0x409   :  { %563 = vrot.lane.b32.xlu1 %v561_v16, %s3097_s27 }
 0x473   :  { %v393_v18 = vpop.permute.xlu0 %392 }
 0x474   :  { %v3352_v19 = vadd.f32 %v393_v18, %v385_v17 }
 0x476   :  { %2972 = vtanh.f32 %v3352_v19 }
 0x47b   :  { %v564_v21 = vpop.permute.xlu1 %563 }
 0x47c   :  { %v3355_v22 = vadd.f32 %v564_v21, %v556_v20 }
 0x47e   :  { %2974 = vtanh.f32 %v3355_v22 }
 0x483   :  { %v2973_v23 = vpop.eup %2972 }
 0x484   :  { %398 = vrot.lane.b32.xlu0 %v2973_v23, %s3096_s26 }
 0x48b   :  { %v2975_v24 = vpop.eup %2974 }
 0x48c   :  { %569 = vrot.lane.b32.xlu1 %v2975_v24, %s3096_s26 }
 0x4f6   :  { %v399_v26 = vpop.permute.xlu0 %398 }
 0x4f7   :  { %v401_v27 = vmul.f32 %v2969_v11, %v399_v26  ;;  %v169_v26 = vadd.f32 %v3327_v44, %v3210_v10 }
 0x4f9   :  { %576 = vrot.lane.b32.xlu0 %v401_v27, %s3097_s27 }
 0x4fe   :  { %v570_v25 = vpop.permute.xlu1 %569 }
 0x4ff   :  { %v572_v28 = vmul.f32 %v2971_v14, %v570_v25 }
 0x501   :  { %746 = vrot.lane.b32.xlu1 %v572_v28, %s3097_s27 }
 0x56b   :  { %v577_v31 = vpop.permute.xlu0 %576 }
 0x56c   :  { %2726 = vmatmul.mubr.msk.f32.vlgmr.msra.gmra.mxu0 %vm201_vm2, %v577_v31  ;;  %2737 = vmatmul.mubr.msk.f32.vlgmr.msra.gmra.mxu1 %vm201_vm2, %v577_v31 }
 0x56d   :  { %2740 = vmatpush3.msra.mxu0 %v3277_v39  ;;  %2747 = vmatprep.mubr.msk.f32.mxu0 %vm3095_vm0, %v3094_v0 }
 0x56e   :  { %2741 = vmatprep.subr.mxu0 %v3094_v0  ;;  %2751 = vmatpush3.msra.mxu1 %v3155_v2 }
 0x56f   :  { %2742 = vmatpush3.msra.mxu0 %v3284_v41  ;;  %2752 = vmatprep.subr.mxu1 %v3094_v0 }
 0x570   :  { %2743 = vmatprep.subr.mxu0 %v3094_v0  ;;  %2753 = vmatpush3.msra.mxu1 %v3166_v4 }
 0x571   :  { %2744 = vmatpush3.msra.mxu0 %v3293_v42  ;;  %2754 = vmatprep.subr.mxu1 %v3094_v0 }
 0x572   :  { %2745 = vmatprep.subr.mxu0 %v3094_v0  ;;  %2755 = vmatpush3.msra.mxu1 %v3179_v7 }
 0x573   :  { %2746 = vmatpush3.msra.mxu0 %v3302_v43  ;;  %v747_v32 = vpop.permute.xlu1 %746  ;;  %2756 = vmatprep.subr.mxu1 %v3094_v0 }
 0x574   :  { %2748 = vmatmul.mubr.msk.f32.vlgmr.msra.gmra.mxu0 %vm201_vm2, %v747_v32  ;;  %2761 = vmatprep.subr.mxu0 %v3094_v0 }
 0x575   :  { %2762 = vmatpush3.msra.mxu0 %v3231_v29  ;;  %2757 = vmatpush3.msra.mxu1 %v3187_v8 }
 0x576   :  { %2763 = vmatprep.subr.mxu0 %v3094_v0  ;;  %2758 = vmatprep.mubr.msk.f32.mxu1 %vm3095_vm0, %v3094_v0 }
 0x577   :  { %2764 = vmatpush3.msra.mxu0 %v3237_v30  ;;  %2772 = vmatprep.subr.mxu1 %v3094_v0 }
 0x578   :  { %2765 = vmatprep.subr.mxu0 %v3094_v0  ;;  %2769 = vmatprep.mubr.msk.f32.mxu0 %vm3095_vm0, %v3094_v0 }
 0x579   :  { %2766 = vmatpush3.msra.mxu0 %v3251_v33 }
 0x57a   :  { %2767 = vmatprep.subr.mxu0 %v3094_v0 }
 0x57b   :  { %2768 = vmatpush3.msra.mxu0 %v3259_v34 }
 0x57c   :  { %2783 = vmatprep.subr.mxu0 %v3094_v0 }
 0x62c   :  { %v646_v36 = vpop.f32.mrf.mxu0  ;;  %v741_v37 = vpop.f32.mrf.mxu1 }
 0x62d   :  { %v650_v38 = vadd.f32 %v646_v36, %v164_v35  ;;  %v742_v51 = vadd.f32 %v3344_v56, %v741_v37 }
 0x62e   :  { %v2727_v40 = vpop.f32.mrf.mxu0  ;;  %v2738_v50 = vpop.f32.mrf.mxu1 }
 0x62f   :  { %2976 = vtanh.f32 %v650_v38  ;;  %v2488_v58 = vmul.f32 -1.442695, %v650_v38 }
 0x634   :  { %v816_v52 = vpop.f32.mrf.mxu0 }
 0x635   :  { %v820_v53 = vadd.f32 %v816_v52, %v742_v51 }
 0x636   :  { %v2749_v54 = vpop.f32.mrf.mxu0 }
 0x637   :  { %2978 = vtanh.f32 %v820_v53  ;;  %v2491_v45 = vmul.f32 -1.442695, %v820_v53 }
 0x638   :  { %2980 = vpow2.f32 %v2488_v58 }
 0x639   :  { %2982 = vpow2.f32 %v2491_v45 }
 0x63c   :  { %v2977_v55 = vpop.eup %2976 }
 0x63d   :  { %660 = vrot.lane.b32.xlu0 %v2977_v55, %s3096_s26 }
 0x644   :  { %v2979_v57 = vpop.eup %2978 }
 0x645   :  { %830 = vrot.lane.b32.xlu1 %v2979_v57, %s3096_s26  ;;  %v2981_v59 = vpop.eup %2980 }
 0x646   :  { %v654_v60 = vadd.f32 1.0, %v2981_v59  ;;  %v2983_v61 = vpop.eup %2982 }
 0x647   :  { %v824_v62 = vadd.f32 1.0, %v2983_v61 }
 0x648   :  { %2984 = vrcp.f32 %v654_v60 }
 0x649   :  { %2986 = vrcp.f32 %v824_v62 }
 0x655   :  { %v2985_v63 = vpop.eup %2984 }
 0x656   :  { %v2987_v5 = vpop.eup %2986  ;;  %v658_v11 = vmul.f32 %v2985_v63, %v3352_v19 }
 0x657   :  { %v828_v14 = vmul.f32 %v2987_v5, %v3355_v22 }
 0x6af   :  { %v661_v1 = vpop.permute.xlu0 %660 }
 0x6b0   :  { %v663_v3 = vmul.f32 %v2985_v63, %v661_v1 }
 0x6b2   :  { %665 = vrot.lane.b32.xlu0 %v663_v3, %s3097_s27 }
 0x6b7   :  { %v831_v6 = vpop.permute.xlu1 %830 }
 0x6b8   :  { %v833_v9 = vmul.f32 %v2987_v5, %v831_v6 }
 0x6ba   :  { %835 = vrot.lane.b32.xlu1 %v833_v9, %s3097_s27 }
 0x724   :  { %v666_v12 = vpop.permute.xlu0 %665 }
 0x725   :  { %v3403_v13 = vadd.f32 %v666_v12, %v658_v11 }
 0x727   :  { %2988 = vtanh.f32 %v3403_v13 }
 0x72c   :  { %v836_v15 = vpop.permute.xlu1 %835 }
 0x72d   :  { %v3407_v16 = vadd.f32 %v836_v15, %v828_v14 }
 0x72f   :  { %2990 = vtanh.f32 %v3407_v16 }
 0x734   :  { %v2989_v17 = vpop.eup %2988 }
 0x735   :  { %671 = vrot.lane.b32.xlu0 %v2989_v17, %s3096_s26 }
 0x73c   :  { %v2991_v18 = vpop.eup %2990 }
 0x73d   :  { %841 = vrot.lane.b32.xlu1 %v2991_v18, %s3096_s26  ;;  %v174_v18 = vadd.f32 %v3210_v10, %v3333_v47 }
 0x7a7   :  { %v672_v20 = vpop.permute.xlu0 %671 }
 0x7a8   :  { %v674_v19 = vmul.f32 %v2985_v63, %v672_v20 }
 0x7aa   :  { %848 = vrot.lane.b32.xlu0 %v674_v19, %s3097_s27 }
 0x7af   :  { %v842_v21 = vpop.permute.xlu1 %841 }
 0x7b0   :  { %v844_v23 = vmul.f32 %v2987_v5, %v842_v21 }
 0x7b2   :  { %1018 = vrot.lane.b32.xlu1 %v844_v23, %s3097_s27 }
 0x81c   :  { %v849_v22 = vpop.permute.xlu0 %848 }
 0x81d   :  { %2759 = vmatmul.mubr.msk.f32.vlgmr.msra.gmra.mxu1 %vm201_vm2, %v849_v22  ;;  %2770 = vmatmul.mubr.msk.f32.vlgmr.msra.gmra.mxu0 %vm201_vm2, %v849_v22 }
 0x81e   :  { %2773 = vmatpush3.msra.mxu1 %v3277_v39  ;;  %2780 = vmatprep.mubr.msk.f32.mxu1 %vm3095_vm0, %v3094_v0 }
 0x81f   :  { %2774 = vmatprep.subr.mxu1 %v3094_v0  ;;  %2784 = vmatpush3.msra.mxu0 %v3155_v2 }
 0x820   :  { %2775 = vmatpush3.msra.mxu1 %v3284_v41  ;;  %2785 = vmatprep.subr.mxu0 %v3094_v0 }
 0x821   :  { %2776 = vmatprep.subr.mxu1 %v3094_v0  ;;  %2786 = vmatpush3.msra.mxu0 %v3166_v4 }
 0x822   :  { %2777 = vmatpush3.msra.mxu1 %v3293_v42  ;;  %2787 = vmatprep.subr.mxu0 %v3094_v0 }
 0x823   :  { %2778 = vmatprep.subr.mxu1 %v3094_v0  ;;  %2788 = vmatpush3.msra.mxu0 %v3179_v7 }
 0x824   :  { %2779 = vmatpush3.msra.mxu1 %v3302_v43  ;;  %v1019_v24 = vpop.permute.xlu1 %1018  ;;  %2789 = vmatprep.subr.mxu0 %v3094_v0 }
 0x825   :  { %2781 = vmatmul.mubr.msk.f32.vlgmr.msra.gmra.mxu1 %vm201_vm2, %v1019_v24  ;;  %2794 = vmatprep.subr.mxu1 %v3094_v0 }
 0x826   :  { %2795 = vmatpush3.msra.mxu1 %v3231_v29  ;;  %2790 = vmatpush3.msra.mxu0 %v3187_v8 }
 0x827   :  { %2796 = vmatprep.subr.mxu1 %v3094_v0  ;;  %2791 = vmatprep.mubr.msk.f32.mxu0 %vm3095_vm0, %v3094_v0 }
 0x828   :  { %2797 = vmatpush3.msra.mxu1 %v3237_v30  ;;  %2802 = vmatprep.mubr.msk.f32.mxu1 %vm3095_vm0, %v3094_v0 }
 0x829   :  { %2798 = vmatprep.subr.mxu1 %v3094_v0  ;;  %2805 = vmatprep.subr.mxu0 %v3094_v0 }
 0x82a   :  { %2799 = vmatpush3.msra.mxu1 %v3251_v33 }
 0x82b   :  { %2800 = vmatprep.subr.mxu1 %v3094_v0 }
 0x82c   :  { %2801 = vmatpush3.msra.mxu1 %v3259_v34 }
 0x82d   :  { %2816 = vmatprep.subr.mxu1 %v3094_v0 }
 0x8dd   :  { %v918_v27 = vpop.f32.mrf.mxu1  ;;  %v1013_v25 = vpop.f32.mrf.mxu0 }
 0x8de   :  { %v922_v28 = vadd.f32 %v918_v27, %v169_v26  ;;  %v1014_v35 = vadd.f32 %v3344_v56, %v1013_v25 }
 0x8df   :  { %v2760_v31 = vpop.f32.mrf.mxu1  ;;  %v2771_v32 = vpop.f32.mrf.mxu0 }
 0x8e0   :  { %2992 = vtanh.f32 %v922_v28  ;;  %v2493_v51 = vmul.f32 -1.442695, %v922_v28 }
 0x8e5   :  { %v1088_v36 = vpop.f32.mrf.mxu1 }
 0x8e6   :  { %v1092_v37 = vadd.f32 %v1088_v36, %v1014_v35 }
 0x8e7   :  { %v2782_v38 = vpop.f32.mrf.mxu1 }
 0x8e8   :  { %2994 = vtanh.f32 %v1092_v37  ;;  %v2496_v44 = vmul.f32 -1.442695, %v1092_v37 }
 0x8e9   :  { %2996 = vpow2.f32 %v2493_v51 }
 0x8ea   :  { %2998 = vpow2.f32 %v2496_v44 }
 0x8ed   :  { %v2993_v40 = vpop.eup %2992 }
 0x8ee   :  { %932 = vrot.lane.b32.xlu0 %v2993_v40, %s3096_s26 }
 0x8f5   :  { %v2995_v50 = vpop.eup %2994 }
 0x8f6   :  { %1102 = vrot.lane.b32.xlu1 %v2995_v50, %s3096_s26  ;;  %v2997_v52 = vpop.eup %2996 }
 0x8f7   :  { %v926_v53 = vadd.f32 1.0, %v2997_v52  ;;  %v2999_v54 = vpop.eup %2998 }
 0x8f8   :  { %v1096_v55 = vadd.f32 1.0, %v2999_v54 }
 0x8f9   :  { %3000 = vrcp.f32 %v926_v53 }
 0x8fa   :  { %3002 = vrcp.f32 %v1096_v55 }
 0x906   :  { %v3001_v57 = vpop.eup %3000 }
 0x907   :  { %v3003_v59 = vpop.eup %3002  ;;  %v930_v62 = vmul.f32 %v3001_v57, %v3403_v13 }
 0x908   :  { %v1100_v3 = vmul.f32 %v3003_v59, %v3407_v16 }
 0x960   :  { %v933_v58 = vpop.permute.xlu0 %932 }
 0x961   :  { %v935_v45 = vmul.f32 %v3001_v57, %v933_v58 }
 0x963   :  { %937 = vrot.lane.b32.xlu0 %v935_v45, %s3097_s27 }
 0x968   :  { %v1103_v60 = vpop.permute.xlu1 %1102 }
 0x969   :  { %v1105_v61 = vmul.f32 %v3003_v59, %v1103_v60 }
 0x96b   :  { %1107 = vrot.lane.b32.xlu1 %v1105_v61, %s3097_s27 }
 0x9d5   :  { %v938_v63 = vpop.permute.xlu0 %937 }
 0x9d6   :  { %v3455_v1 = vadd.f32 %v938_v63, %v930_v62 }
 0x9d8   :  { %3004 = vtanh.f32 %v3455_v1 }
 0x9dd   :  { %v1108_v5 = vpop.permute.xlu1 %1107 }
 0x9de   :  { %v3459_v6 = vadd.f32 %v1108_v5, %v1100_v3 }
 0x9e0   :  { %3006 = vtanh.f32 %v3459_v6 }
 0x9e5   :  { %v3005_v9 = vpop.eup %3004 }
 0x9e6   :  { %943 = vrot.lane.b32.xlu0 %v3005_v9, %s3096_s26 }
 0x9ed   :  { %v3007_v11 = vpop.eup %3006 }
 0x9ee   :  { %1113 = vrot.lane.b32.xlu1 %v3007_v11, %s3096_s26 }
 0xa58   :  { %v944_v12 = vpop.permute.xlu0 %943 }
 0xa59   :  { %v946_v13 = vmul.f32 %v3001_v57, %v944_v12 }
 0xa5b   :  { %1120 = vrot.lane.b32.xlu0 %v946_v13, %s3097_s27 }
 0xa60   :  { %v1114_v14 = vpop.permute.xlu1 %1113 }
 0xa61   :  { %v1116_v15 = vmul.f32 %v3003_v59, %v1114_v14 }
 0xa63   :  { %1290 = vrot.lane.b32.xlu1 %v1116_v15, %s3097_s27 }
 0xacd   :  { %v1121_v16 = vpop.permute.xlu0 %1120 }
 0xace   :  { %2792 = vmatmul.mubr.msk.f32.vlgmr.msra.gmra.mxu0 %vm201_vm2, %v1121_v16  ;;  %2803 = vmatmul.mubr.msk.f32.vlgmr.msra.gmra.mxu1 %vm201_vm2, %v1121_v16 }
 0xacf   :  { %2806 = vmatpush3.msra.mxu0 %v3277_v39  ;;  %2813 = vmatprep.mubr.msk.f32.mxu0 %vm3095_vm0, %v3094_v0 }
 0xad0   :  { %2807 = vmatprep.subr.mxu0 %v3094_v0  ;;  %2817 = vmatpush3.msra.mxu1 %v3155_v2 }
 0xad1   :  { %2808 = vmatpush3.msra.mxu0 %v3284_v41  ;;  %2818 = vmatprep.subr.mxu1 %v3094_v0 }
 0xad2   :  { %2809 = vmatprep.subr.mxu0 %v3094_v0  ;;  %2819 = vmatpush3.msra.mxu1 %v3166_v4 }
 0xad3   :  { %2810 = vmatpush3.msra.mxu0 %v3293_v42  ;;  %2820 = vmatprep.subr.mxu1 %v3094_v0 }
 0xad4   :  { %2811 = vmatprep.subr.mxu0 %v3094_v0  ;;  %2821 = vmatpush3.msra.mxu1 %v3179_v7 }
 0xad5   :  { %2812 = vmatpush3.msra.mxu0 %v3302_v43  ;;  %v1291_v17 = vpop.permute.xlu1 %1290  ;;  %2822 = vmatprep.subr.mxu1 %v3094_v0 }
 0xad6   :  { %2814 = vmatmul.mubr.msk.f32.vlgmr.msra.gmra.mxu0 %vm201_vm2, %v1291_v17  ;;  %2827 = vmatprep.subr.mxu0 %v3094_v0 }
 0xad7   :  { %2828 = vmatpush3.msra.mxu0 %v3231_v29  ;;  %2823 = vmatpush3.msra.mxu1 %v3187_v8 }
 0xad8   :  { %2829 = vmatprep.subr.mxu0 %v3094_v0  ;;  %2824 = vmatprep.mubr.msk.f32.mxu1 %vm3095_vm0, %v3094_v0 }
 0xad9   :  { %2830 = vmatpush3.msra.mxu0 %v3237_v30  ;;  %2838 = vmatprep.subr.mxu1 %v3094_v0 }
 0xada   :  { %2831 = vmatprep.subr.mxu0 %v3094_v0  ;;  %2835 = vmatprep.mubr.msk.f32.mxu0 %vm3095_vm0, %v3094_v0 }
 0xadb   :  { %2832 = vmatpush3.msra.mxu0 %v3251_v33 }
 0xadc   :  { %2833 = vmatprep.subr.mxu0 %v3094_v0 }
 0xadd   :  { %2834 = vmatpush3.msra.mxu0 %v3259_v34 }
 0xade   :  { %2849 = vmatprep.subr.mxu0 %v3094_v0 }
 0xb8e   :  { %v1190_v20 = vpop.f32.mrf.mxu0  ;;  %v1285_v19 = vpop.f32.mrf.mxu1 }
 0xb8f   :  { %v1194_v21 = vadd.f32 %v1190_v20, %v174_v18  ;;  %v1286_v24 = vadd.f32 %v3344_v56, %v1285_v19 }
 0xb90   :  { %v2793_v23 = vpop.f32.mrf.mxu0  ;;  %v2804_v22 = vpop.f32.mrf.mxu1 }
 0xb91   :  { %3008 = vtanh.f32 %v1194_v21  ;;  %v2498_v32 = vmul.f32 -1.442695, %v1194_v21 }
 0xb96   :  { %v1360_v26 = vpop.f32.mrf.mxu0 }
 0xb97   :  { %v1364_v27 = vadd.f32 %v1360_v26, %v1286_v24 }
 0xb98   :  { %v2815_v25 = vpop.f32.mrf.mxu0 }
 0xb99   :  { %3010 = vtanh.f32 %v1364_v27  ;;  %v2501_v47 = vmul.f32 -1.442695, %v1364_v27 }
 0xb9a   :  { %3012 = vpow2.f32 %v2498_v32 }
 0xb9b   :  { %3014 = vpow2.f32 %v2501_v47 }
 0xb9e   :  { %v3009_v28 = vpop.eup %3008 }
 0xb9f   :  { %1204 = vrot.lane.b32.xlu0 %v3009_v28, %s3096_s26 }
 0xba6   :  { %v3011_v31 = vpop.eup %3010 }
 0xba7   :  { %1374 = vrot.lane.b32.xlu1 %v3011_v31, %s3096_s26  ;;  %v3013_v35 = vpop.eup %3012 }
 0xba8   :  { %v1198_v36 = vadd.f32 1.0, %v3013_v35  ;;  %v3015_v37 = vpop.eup %3014 }
 0xba9   :  { %v1368_v38 = vadd.f32 1.0, %v3015_v37 }
 0xbaa   :  { %3016 = vrcp.f32 %v1198_v36 }
 0xbab   :  { %3018 = vrcp.f32 %v1368_v38 }
 0xbb7   :  { %v3017_v40 = vpop.eup %3016 }
 0xbb8   :  { %v3019_v44 = vpop.eup %3018  ;;  %v1202_v54 = vmul.f32 %v3017_v40, %v3455_v1 }
 0xbb9   :  { %v1372_v58 = vmul.f32 %v3019_v44, %v3459_v6 }
 0xc11   :  { %v1205_v50 = vpop.permute.xlu0 %1204 }
 0xc12   :  { %v1207_v51 = vmul.f32 %v3017_v40, %v1205_v50 }
 0xc14   :  { %1209 = vrot.lane.b32.xlu0 %v1207_v51, %s3097_s27 }
 0xc19   :  { %v1375_v52 = vpop.permute.xlu1 %1374 }
 0xc1a   :  { %v1377_v53 = vmul.f32 %v3019_v44, %v1375_v52 }
 0xc1c   :  { %1379 = vrot.lane.b32.xlu1 %v1377_v53, %s3097_s27  ;;  %v3080_v53 = vld [vmem:[%s3726_s2 + $0x18] sm:$0xff] }
 0xc86   :  { %v1210_v55 = vpop.permute.xlu0 %1209 }
 0xc87   :  { %v3507_v57 = vadd.f32 %v1210_v55, %v1202_v54  ;;  %v3082_v54 = vld [vmem:[%s3726_s2 + $0x8] sm:$0xff] }
 0xc89   :  { %3020 = vtanh.f32 %v3507_v57 }
 0xc8e   :  { %v1380_v45 = vpop.permute.xlu1 %1379 }
 0xc8f   :  { %v3511_v59 = vadd.f32 %v1380_v45, %v1372_v58 }
 0xc91   :  { %3022 = vtanh.f32 %v3511_v59 }
 0xc96   :  { %v3021_v60 = vpop.eup %3020 }
 0xc97   :  { %1215 = vrot.lane.b32.xlu0 %v3021_v60, %s3096_s26 }
 0xc9e   :  { %v3023_v61 = vpop.eup %3022 }
 0xc9f   :  { %1385 = vrot.lane.b32.xlu1 %v3023_v61, %s3096_s26 }
 0xd09   :  { %v1216_v62 = vpop.permute.xlu0 %1215 }
 0xd0a   :  { %v1218_v63 = vmul.f32 %v3017_v40, %v1216_v62 }
 0xd0c   :  { %1392 = vrot.lane.b32.xlu0 %v1218_v63, %s3097_s27 }
 0xd11   :  { %v1386_v1 = vpop.permute.xlu1 %1385 }
 0xd12   :  { %v1388_v3 = vmul.f32 %v3019_v44, %v1386_v1 }
 0xd14   :  { %1562 = vrot.lane.b32.xlu1 %v1388_v3, %s3097_s27 }
 0xd7e   :  { %v1393_v5 = vpop.permute.xlu0 %1392 }
 0xd7f   :  { %2825 = vmatmul.mubr.msk.f32.vlgmr.msra.gmra.mxu1 %vm201_vm2, %v1393_v5  ;;  %2836 = vmatmul.mubr.msk.f32.vlgmr.msra.gmra.mxu0 %vm201_vm2, %v1393_v5 }
 0xd80   :  { %2839 = vmatpush3.msra.mxu1 %v3277_v39  ;;  %2846 = vmatprep.mubr.msk.f32.mxu1 %vm3095_vm0, %v3094_v0 }
 0xd81   :  { %2840 = vmatprep.subr.mxu1 %v3094_v0  ;;  %2850 = vmatpush3.msra.mxu0 %v3155_v2  ;;  %v179_v2 = vadd.f32 %v3331_v46, %v3210_v10 }
 0xd82   :  { %2841 = vmatpush3.msra.mxu1 %v3284_v41  ;;  %2851 = vmatprep.subr.mxu0 %v3094_v0 }
 0xd83   :  { %2842 = vmatprep.subr.mxu1 %v3094_v0  ;;  %2852 = vmatpush3.msra.mxu0 %v3166_v4 }
 0xd84   :  { %2843 = vmatpush3.msra.mxu1 %v3293_v42  ;;  %2853 = vmatprep.subr.mxu0 %v3094_v0 }
 0xd85   :  { %2844 = vmatprep.subr.mxu1 %v3094_v0  ;;  %2854 = vmatpush3.msra.mxu0 %v3179_v7 }
 0xd86   :  { %2845 = vmatpush3.msra.mxu1 %v3302_v43  ;;  %v1563_v6 = vpop.permute.xlu1 %1562  ;;  %2855 = vmatprep.subr.mxu0 %v3094_v0 }
 0xd87   :  { %2847 = vmatmul.mubr.msk.f32.vlgmr.msra.gmra.mxu1 %vm201_vm2, %v1563_v6  ;;  %2860 = vmatprep.subr.mxu1 %v3094_v0 }
 0xd88   :  { %2861 = vmatpush3.msra.mxu1 %v3231_v29  ;;  %2856 = vmatpush3.msra.mxu0 %v3187_v8 }
 0xd89   :  { %2862 = vmatprep.subr.mxu1 %v3094_v0  ;;  %2857 = vmatprep.mubr.msk.f32.mxu0 %vm3095_vm0, %v3094_v0 }
 0xd8a   :  { %2863 = vmatpush3.msra.mxu1 %v3237_v30  ;;  %2868 = vmatprep.mubr.msk.f32.mxu1 %vm3095_vm0, %v3094_v0 }
 0xd8b   :  { %2864 = vmatprep.subr.mxu1 %v3094_v0  ;;  %2871 = vmatprep.subr.mxu0 %v3094_v0 }
 0xd8c   :  { %2865 = vmatpush3.msra.mxu1 %v3251_v33 }
 0xd8d   :  { %2866 = vmatprep.subr.mxu1 %v3094_v0 }
 0xd8e   :  { %2867 = vmatpush3.msra.mxu1 %v3259_v34 }
 0xd8f   :  { %2882 = vmatprep.subr.mxu1 %v3094_v0 }
 0xe3f   :  { %v1462_v4 = vpop.f32.mrf.mxu1  ;;  %v1557_v7 = vpop.f32.mrf.mxu0 }
 0xe40   :  { %v1466_v8 = vadd.f32 %v1462_v4, %v179_v2  ;;  %v1558_v12 = vadd.f32 %v3344_v56, %v1557_v7 }
 0xe41   :  { %v2826_v9 = vpop.f32.mrf.mxu1  ;;  %v2837_v11 = vpop.f32.mrf.mxu0 }
 0xe42   :  { %3024 = vtanh.f32 %v1466_v8  ;;  %v2503_v18 = vmul.f32 -1.442695, %v1466_v8 }
 0xe47   :  { %v1632_v13 = vpop.f32.mrf.mxu1 }
 0xe48   :  { %v1636_v14 = vadd.f32 %v1632_v13, %v1558_v12 }
 0xe49   :  { %v2848_v15 = vpop.f32.mrf.mxu1 }
 0xe4a   :  { %3026 = vtanh.f32 %v1636_v14  ;;  %v2506_v10 = vmul.f32 -1.442695, %v1636_v14 }
 0xe4b   :  { %3028 = vpow2.f32 %v2503_v18 }
 0xe4c   :  { %3030 = vpow2.f32 %v2506_v10 }
 0xe4f   :  { %v3025_v16 = vpop.eup %3024 }
 0xe50   :  { %1476 = vrot.lane.b32.xlu0 %v3025_v16, %s3096_s26 }
 0xe57   :  { %v3027_v17 = vpop.eup %3026 }
 0xe58   :  { %1646 = vrot.lane.b32.xlu1 %v3027_v17, %s3096_s26  ;;  %v3029_v46 = vpop.eup %3028 }
 0xe59   :  { %v1470_v20 = vadd.f32 1.0, %v3029_v46  ;;  %v3031_v19 = vpop.eup %3030 }
 0xe5a   :  { %v1640_v21 = vadd.f32 1.0, %v3031_v19 }
 0xe5b   :  { %3032 = vrcp.f32 %v1470_v20 }
 0xe5c   :  { %3034 = vrcp.f32 %v1640_v21 }
 0xe68   :  { %v3033_v23 = vpop.eup %3032 }
 0xe69   :  { %v3035_v26 = vpop.eup %3034  ;;  %v1474_v28 = vmul.f32 %v3033_v23, %v3507_v57 }
 0xe6a   :  { %v1644_v47 = vmul.f32 %v3035_v26, %v3511_v59 }
 0xec2   :  { %v1477_v22 = vpop.permute.xlu0 %1476 }
 0xec3   :  { %v1479_v24 = vmul.f32 %v3033_v23, %v1477_v22  ;;  %v3085_v22 = vld [vmem:[%s3730_s5 + $0x18] sm:$0xff] }
 0xec5   :  { %1481 = vrot.lane.b32.xlu0 %v1479_v24, %s3097_s27  ;;  %v3086_v24 = vld [vmem:[%s3729_s4 + $0x18] sm:$0xff] }
 0xeca   :  { %v1647_v27 = vpop.permute.xlu1 %1646 }
 0xecb   :  { %v1649_v25 = vmul.f32 %v3035_v26, %v1647_v27  ;;  %v3088_v27 = vld [vmem:[%s3729_s4 + $0x10] sm:$0xff] }
 0xecd   :  { %1651 = vrot.lane.b32.xlu1 %v1649_v25, %s3097_s27  ;;  %v3089_v25 = vld [vmem:[%s3730_s5 + $0x8] sm:$0xff] }
 0xf37   :  { %v1482_v31 = vpop.permute.xlu0 %1481 }
 0xf38   :  { %v3559_v32 = vadd.f32 %v1482_v31, %v1474_v28  ;;  %v3090_v28 = vld [vmem:[%s3729_s4 + $0x8] sm:$0xff]  ;;  %v3091_v31 = vld [vmem:[%s3730_s5] sm:$0xff] }
 0xf3a   :  { %3036 = vtanh.f32 %v3559_v32 }
 0xf3f   :  { %v1652_v35 = vpop.permute.xlu1 %1651 }
 0xf40   :  { %v3563_v36 = vadd.f32 %v1652_v35, %v1644_v47  ;;  %v3092_v47 = vld [vmem:[%s3729_s4] sm:$0xff] }
 0xf42   :  { %3038 = vtanh.f32 %v3563_v36 }
 0xf47   :  { %v3037_v37 = vpop.eup %3036 }
 0xf48   :  { %1487 = vrot.lane.b32.xlu0 %v3037_v37, %s3096_s26 }
 0xf4f   :  { %v3039_v38 = vpop.eup %3038 }
 0xf50   :  { %1657 = vrot.lane.b32.xlu1 %v3039_v38, %s3096_s26 }
 0xfba   :  { %v1488_v40 = vpop.permute.xlu0 %1487 }
 0xfbb   :  { %v1490_v50 = vmul.f32 %v3033_v23, %v1488_v40 }
 0xfbd   :  { %1664 = vrot.lane.b32.xlu0 %v1490_v50, %s3097_s27 }
 0xfc2   :  { %v1658_v51 = vpop.permute.xlu1 %1657 }
 0xfc3   :  { %v1660_v44 = vmul.f32 %v3035_v26, %v1658_v51  ;;  %v3087_v26 = vld [vmem:[%s3730_s5 + $0x10] sm:$0xff] }
 0xfc5   :  { %1834 = vrot.lane.b32.xlu1 %v1660_v44, %s3097_s27 }
0x102f   :  { %v1665_v52 = vpop.permute.xlu0 %1664 }
0x1030   :  { %2858 = vmatmul.mubr.msk.f32.vlgmr.msra.gmra.mxu0 %vm201_vm2, %v1665_v52  ;;  %2869 = vmatmul.mubr.msk.f32.vlgmr.msra.gmra.mxu1 %vm201_vm2, %v1665_v52 }
0x1031   :  { %2872 = vmatpush3.msra.mxu0 %v3277_v39  ;;  %2879 = vmatprep.mubr.msk.f32.mxu0 %vm3095_vm0, %v3094_v0  ;;  %v3081_v39 = vld [vmem:[%s3726_s2 + $0x10] sm:$0xff] }
0x1032   :  { %2873 = vmatprep.subr.mxu0 %v3094_v0  ;;  %2883 = vmatpush3.msra.mxu1 %v3080_v53 }
0x1033   :  { %2874 = vmatpush3.msra.mxu0 %v3284_v41  ;;  %2884 = vmatprep.subr.mxu1 %v3094_v0 }
0x1034   :  { %2875 = vmatprep.subr.mxu0 %v3094_v0  ;;  %2885 = vmatpush3.msra.mxu1 %v3081_v39 }
0x1035   :  { %2876 = vmatpush3.msra.mxu0 %v3293_v42  ;;  %2886 = vmatprep.subr.mxu1 %v3094_v0  ;;  %v3083_v42 = vld [vmem:[%s3726_s2] sm:$0xff] }
0x1036   :  { %2877 = vmatprep.subr.mxu0 %v3094_v0  ;;  %2887 = vmatpush3.msra.mxu1 %v3082_v54 }
0x1037   :  { %2878 = vmatpush3.msra.mxu0 %v3302_v43  ;;  %v1835_v41 = vpop.permute.xlu1 %1834  ;;  %2888 = vmatprep.subr.mxu1 %v3094_v0 }
0x1038   :  { %2880 = vmatmul.mubr.msk.f32.vlgmr.msra.gmra.mxu0 %vm201_vm2, %v1835_v41  ;;  %2893 = vmatprep.subr.mxu0 %v3094_v0 }
0x1039   :  { %2894 = vmatpush3.msra.mxu0 %v3231_v29  ;;  %2889 = vmatpush3.msra.mxu1 %v3083_v42  ;;  %v3614_v29 = vld [vmem:[%s3728_s3] ss:$0 sm:$0xff] }
0x103a   :  { %2895 = vmatprep.subr.mxu0 %v3094_v0  ;;  %2890 = vmatprep.mubr.msk.f32.mxu1 %vm3095_vm0, %v3094_v0  ;;  %v189_v35 = vadd.f32 %v3614_v29, %v3335_v48 }
0x103b   :  { %2896 = vmatpush3.msra.mxu0 %v3237_v30  ;;  %2904 = vmatprep.subr.mxu1 %v3094_v0  ;;  %v184_v30 = vadd.f32 %v3614_v29, %v3337_v49 }
0x103c   :  { %2897 = vmatprep.subr.mxu0 %v3094_v0  ;;  %2901 = vmatprep.mubr.msk.f32.mxu0 %vm3095_vm0, %v3094_v0 }
0x103d   :  { %2898 = vmatpush3.msra.mxu0 %v3251_v33 }
0x103e   :  { %2899 = vmatprep.subr.mxu0 %v3094_v0 }
0x103f   :  { %2900 = vmatpush3.msra.mxu0 %v3259_v34 }
0x1040   :  { %2915 = vmatprep.subr.mxu0 %v3094_v0 }
0x10f0   :  { %v1734_v43 = vpop.f32.mrf.mxu0  ;;  %v1829_v55 = vpop.f32.mrf.mxu1 }
0x10f1   :  { %v1738_v57 = vadd.f32 %v1734_v43, %v184_v30  ;;  %v1830_v33 = vadd.f32 %v3344_v56, %v1829_v55 }
0x10f2   :  { %v2859_v58 = vpop.f32.mrf.mxu0  ;;  %v2870_v45 = vpop.f32.mrf.mxu1 }
0x10f3   :  { %3040 = vtanh.f32 %v1738_v57  ;;  %v2508_v63 = vmul.f32 -1.442695, %v1738_v57 }
0x10f8   :  { %v1904_v59 = vpop.f32.mrf.mxu0 }
0x10f9   :  { %v1908_v34 = vadd.f32 %v1904_v59, %v1830_v33 }
0x10fa   :  { %v2881_v60 = vpop.f32.mrf.mxu0 }
0x10fb   :  { %3042 = vtanh.f32 %v1908_v34  ;;  %v2511_v49 = vmul.f32 -1.442695, %v1908_v34 }
0x10fc   :  { %3044 = vpow2.f32 %v2508_v63 }
0x10fd   :  { %3046 = vpow2.f32 %v2511_v49 }
0x1100   :  { %v3041_v61 = vpop.eup %3040 }
0x1101   :  { %1748 = vrot.lane.b32.xlu0 %v3041_v61, %s3096_s26 }
0x1108   :  { %v3043_v62 = vpop.eup %3042 }
0x1109   :  { %1918 = vrot.lane.b32.xlu1 %v3043_v62, %s3096_s26  ;;  %v3045_v1 = vpop.eup %3044 }
0x110a   :  { %v1742_v3 = vadd.f32 1.0, %v3045_v1  ;;  %v3047_v5 = vpop.eup %3046 }
0x110b   :  { %v1912_v6 = vadd.f32 1.0, %v3047_v5 }
0x110c   :  { %3048 = vrcp.f32 %v1742_v3 }
0x110d   :  { %3050 = vrcp.f32 %v1912_v6 }
0x1119   :  { %v3049_v2 = vpop.eup %3048 }
0x111a   :  { %v3051_v8 = vpop.eup %3050  ;;  %v1746_v12 = vmul.f32 %v3049_v2, %v3559_v32 }
0x111b   :  { %v1916_v15 = vmul.f32 %v3051_v8, %v3563_v36 }
0x1173   :  { %v1749_v4 = vpop.permute.xlu0 %1748 }
0x1174   :  { %v1751_v7 = vmul.f32 %v3049_v2, %v1749_v4 }
0x1176   :  { %1753 = vrot.lane.b32.xlu0 %v1751_v7, %s3097_s27 }
0x117b   :  { %v1919_v9 = vpop.permute.xlu1 %1918 }
0x117c   :  { %v1921_v11 = vmul.f32 %v3051_v8, %v1919_v9 }
0x117e   :  { %1923 = vrot.lane.b32.xlu1 %v1921_v11, %s3097_s27  ;;  %v3093_v11 = vld [vmem:[%s3731_s6] ss:$0 sm:$0xff] }
0x11e8   :  { %v1754_v13 = vpop.permute.xlu0 %1753 }
0x11e9   :  { %v3624_v14 = vadd.f32 %v1754_v13, %v1746_v12 }
0x11eb   :  { %3052 = vtanh.f32 %v3624_v14 }
0x11f0   :  { %v1924_v16 = vpop.permute.xlu1 %1923 }
0x11f1   :  { %v3628_v17 = vadd.f32 %v1924_v16, %v1916_v15 }
0x11f3   :  { %3054 = vtanh.f32 %v3628_v17 }
0x11f8   :  { %v3053_v18 = vpop.eup %3052 }
0x11f9   :  { %1759 = vrot.lane.b32.xlu0 %v3053_v18, %s3096_s26 }
0x1200   :  { %v3055_v10 = vpop.eup %3054 }
0x1201   :  { %1929 = vrot.lane.b32.xlu1 %v3055_v10, %s3096_s26 }
0x126b   :  { %v1760_v46 = vpop.permute.xlu0 %1759 }
0x126c   :  { %v1762_v20 = vmul.f32 %v3049_v2, %v1760_v46 }
0x126e   :  { %1936 = vrot.lane.b32.xlu0 %v1762_v20, %s3097_s27 }
0x1273   :  { %v1930_v19 = vpop.permute.xlu1 %1929 }
0x1274   :  { %v1932_v21 = vmul.f32 %v3051_v8, %v1930_v19 }
0x1276   :  { %2106 = vrot.lane.b32.xlu1 %v1932_v21, %s3097_s27 }
0x12e0   :  { %v1937_v23 = vpop.permute.xlu0 %1936 }
0x12e1   :  { %2891 = vmatmul.mubr.msk.f32.vlgmr.msra.gmra.mxu1 %vm201_vm2, %v1937_v23  ;;  %2902 = vmatmul.mubr.msk.f32.vlgmr.msra.gmra.mxu0 %vm201_vm2, %v1937_v23 }
0x12e2   :  { %2905 = vmatpush3.msra.mxu1 %v3085_v22  ;;  %2912 = vmatprep.mubr.msk.f32.mxu1 %vm3095_vm0, %v3094_v0 }
0x12e3   :  { %2906 = vmatprep.subr.mxu1 %v3094_v0  ;;  %2916 = vmatpush3.msra.mxu0 %v3086_v24  ;;  %v2383_v24 = vld [vmem:[%s3732_s7 + $0x18] sm:$0xff] }
0x12e4   :  { %2907 = vmatpush3.msra.mxu1 %v3087_v26  ;;  %2917 = vmatprep.subr.mxu0 %v3094_v0 }
0x12e5   :  { %2908 = vmatprep.subr.mxu1 %v3094_v0  ;;  %2918 = vmatpush3.msra.mxu0 %v3088_v27  ;;  %v2381_v27 = vld [vmem:[%s3732_s7 + $0x8] sm:$0xff] }
0x12e6   :  { %2909 = vmatpush3.msra.mxu1 %v3089_v25  ;;  %2919 = vmatprep.subr.mxu0 %v3094_v0 }
0x12e7   :  { %2910 = vmatprep.subr.mxu1 %v3094_v0  ;;  %2920 = vmatpush3.msra.mxu0 %v3090_v28 }
0x12e8   :  { %2911 = vmatpush3.msra.mxu1 %v3091_v31  ;;  %v2107_v32 = vpop.permute.xlu1 %2106  ;;  %2921 = vmatprep.subr.mxu0 %v3094_v0 }
0x12e9   :  { %2913 = vmatmul.mubr.msk.f32.vlgmr.msra.gmra.mxu1 %vm201_vm2, %v2107_v32  ;;  %2922 = vmatpush3.msra.mxu0 %v3092_v47 }
0x12ea   :  { %2923 = vmatprep.mubr.msk.f32.mxu0 %vm3095_vm0, %v3094_v0  ;;  %2926 = vmatprep.subr.mxu1 %v3094_v0 }
0x12eb   :  { %2927 = vmatpush3.msra.mxu1 %v3085_v22  ;;  %2934 = vmatprep.mubr.msk.f32.mxu1 %vm3095_vm0, %v3094_v0 }
0x12ec   :  { %2928 = vmatprep.subr.mxu1 %v3094_v0  ;;  %2937 = vmatprep.subr.mxu0 %v3094_v0 }
0x12ed   :  { %2929 = vmatpush3.msra.mxu1 %v3087_v26  ;;  %v2382_v26 = vld [vmem:[%s3732_s7 + $0x10] sm:$0xff] }
0x12ee   :  { %2930 = vmatprep.subr.mxu1 %v3094_v0 }
0x12ef   :  { %2931 = vmatpush3.msra.mxu1 %v3089_v25  ;;  %v2380_v25 = vld [vmem:[%s3732_s7] sm:$0xff] }
0x12f0   :  { %2932 = vmatprep.subr.mxu1 %v3094_v0 }
0x12f1   :  { %2933 = vmatpush3.msra.mxu1 %v3091_v31 }
0x13a1   :  { %v2006_v36 = vpop.f32.mrf.mxu1  ;;  %v2101_v37 = vpop.f32.mrf.mxu0 }
0x13a2   :  { %v2010_v38 = vadd.f32 %v2006_v36, %v189_v35  ;;  %v2102_v51 = vadd.f32 %v3344_v56, %v2101_v37  ;;  %v2520_v35 = vld [vmem:[%s3733_s8] ss:$0 sm:$0xff] }
0x13a3   :  { %v2892_v40 = vpop.f32.mrf.mxu1  ;;  %v2903_v50 = vpop.f32.mrf.mxu0 }
0x13a4   :  { %3056 = vtanh.f32 %v2010_v38  ;;  %v2513_v41 = vmul.f32 -1.442695, %v2010_v38 }
0x13a9   :  { %v2176_v44 = vpop.f32.mrf.mxu1 }
0x13aa   :  { %v2180_v52 = vadd.f32 %v2176_v44, %v2102_v51 }
0x13ab   :  { %v2914_v53 = vpop.f32.mrf.mxu1 }
0x13ac   :  { %3058 = vtanh.f32 %v2180_v52  ;;  %v2516_v48 = vmul.f32 -1.442695, %v2180_v52 }
0x13ad   :  { %3060 = vpow2.f32 %v2513_v41 }
0x13ae   :  { %3062 = vpow2.f32 %v2516_v48 }
0x13b1   :  { %v3057_v39 = vpop.eup %3056 }
0x13b2   :  { %2020 = vrot.lane.b32.xlu0 %v3057_v39, %s3096_s26 }
0x13b9   :  { %v3059_v54 = vpop.eup %3058 }
0x13ba   :  { %2190 = vrot.lane.b32.xlu1 %v3059_v54, %s3096_s26  ;;  %v3061_v42 = vpop.eup %3060 }
0x13bb   :  { %v2014_v29 = vadd.f32 1.0, %v3061_v42  ;;  %v3063_v30 = vpop.eup %3062 }
0x13bc   :  { %v2184_v43 = vadd.f32 1.0, %v3063_v30 }
0x13bd   :  { %3064 = vrcp.f32 %v2014_v29 }
0x13be   :  { %3066 = vrcp.f32 %v2184_v43 }
0x13ca   :  { %v3065_v56 = vpop.eup %3064 }
0x13cb   :  { %v3067_v58 = vpop.eup %3066  ;;  %v2018_v59 = vmul.f32 %v3065_v56, %v3624_v14 }
0x13cc   :  { %v2188_v61 = vmul.f32 %v3067_v58, %v3628_v17 }
0x1424   :  { %v2021_v55 = vpop.permute.xlu0 %2020 }
0x1425   :  { %v2023_v57 = vmul.f32 %v3065_v56, %v2021_v55 }
0x1427   :  { %2025 = vrot.lane.b32.xlu0 %v2023_v57, %s3097_s27 }
0x142c   :  { %v2191_v45 = vpop.permute.xlu1 %2190 }
0x142d   :  { %v2193_v33 = vmul.f32 %v3067_v58, %v2191_v45 }
0x142f   :  { %2195 = vrot.lane.b32.xlu1 %v2193_v33, %s3097_s27 }
0x1499   :  { %v2026_v34 = vpop.permute.xlu0 %2025 }
0x149a   :  { %v2028_v60 = vadd.f32 %v2026_v34, %v2018_v59 }
0x149c   :  { %3068 = vtanh.f32 %v2028_v60 }
0x14a1   :  { %v2196_v62 = vpop.permute.xlu1 %2195 }
0x14a2   :  { %v2198_v63 = vadd.f32 %v2196_v62, %v2188_v61 }
0x14a4   :  { %3070 = vtanh.f32 %v2198_v63 }
0x14a9   :  { %v3069_v49 = vpop.eup %3068 }
0x14aa   :  { %2031 = vrot.lane.b32.xlu0 %v3069_v49, %s3096_s26 }
0x14b1   :  { %v3071_v1 = vpop.eup %3070 }
0x14b2   :  { %2201 = vrot.lane.b32.xlu1 %v3071_v1, %s3096_s26 }
0x151c   :  { %v2032_v3 = vpop.permute.xlu0 %2031 }
0x151d   :  { %v2034_v5 = vmul.f32 %v3065_v56, %v2032_v3 }
0x151f   :  { %2206 = vrot.lane.b32.xlu0 %v2034_v5, %s3097_s27 }
0x1524   :  { %v2202_v6 = vpop.permute.xlu1 %2201 }
0x1525   :  { %v2204_v2 = vmul.f32 %v3067_v58, %v2202_v6 }
0x1527   :  { %2281 = vrot.lane.b32.xlu1 %v2204_v2, %s3097_s27 }
0x1591   :  { %v2207_v4 = vpop.permute.xlu0 %2206 }
0x1592   :  { %2924 = vmatmul.mubr.msk.f32.vlgmr.msra.gmra.mxu0 %vm201_vm2, %v2207_v4 }
0x1593   :  { %2945 = vmatprep.mubr.msk.f32.mxu0 %vm3095_vm0, %v3094_v0  ;;  %2938 = vmatpush3.msra.mxu0 %v2383_v24 }
0x1594   :  { %2939 = vmatprep.subr.mxu0 %v3094_v0 }
0x1595   :  { %2940 = vmatpush3.msra.mxu0 %v2382_v26 }
0x1596   :  { %2941 = vmatprep.subr.mxu0 %v3094_v0 }
0x1597   :  { %2942 = vmatpush3.msra.mxu0 %v2381_v27 }
0x1598   :  { %2943 = vmatprep.subr.mxu0 %v3094_v0 }
0x1599   :  { %v2282_v7 = vpop.permute.xlu1 %2281  ;;  %2944 = vmatpush3.msra.mxu0 %v2380_v25 }
0x159a   :  { %2935 = vmatmul.mubr.msk.f32.vlgmr.msra.gmra.mxu1 %vm201_vm2, %v2282_v7 }
0x1652   :  { %v2276_v8 = vpop.f32.mrf.mxu0 }
0x1653   :  { %v2277_v12 = vadd.f32 %v3093_v11, %v2276_v8 }
0x1654   :  { %v2925_v9 = vpop.f32.mrf.mxu0 }
0x165a   :  { %v2351_v13 = vpop.f32.mrf.mxu1 }
0x165b   :  { %v2355_v14 = vadd.f32 %v2351_v13, %v2277_v12 }
0x165c   :  { %v2936_v15 = vpop.f32.mrf.mxu1 }
0x165d   :  { %3072 = vtanh.f32 %v2355_v14  ;;  %v2519_v17 = vmul.f32 -1.442695, %v2355_v14 }
0x165f   :  { %3074 = vpow2.f32 %v2519_v17 }
0x166a   :  { %v3073_v16 = vpop.eup %3072 }
0x166b   :  { %2365 = vrot.lane.b32.xlu0 %v3073_v16, %s3096_s26 }
0x166c   :  { %v3075_v18 = vpop.eup %3074 }
0x166d   :  { %v2359_v10 = vadd.f32 1.0, %v3075_v18 }
0x166f   :  { %3076 = vrcp.f32 %v2359_v10 }
0x167c   :  { %v3077_v46 = vpop.eup %3076 }
0x167d   :  { %v2363_v21 = vmul.f32 %v3077_v46, %v2198_v63 }
0x16dd   :  { %v2366_v20 = vpop.permute.xlu0 %2365 }
0x16de   :  { %v2368_v19 = vmul.f32 %v3077_v46, %v2366_v20 }
0x16e0   :  { %2370 = vrot.lane.b32.xlu1 %v2368_v19, %s3097_s27 }
0x1752   :  { %v2371_v23 = vpop.permute.xlu1 %2370 }
0x1753   :  { %v2373_v22 = vadd.f32 %v2371_v23, %v2363_v21 }
0x1755   :  { %3078 = vtanh.f32 %v2373_v22 }
0x1762   :  { %v3079_v28 = vpop.eup %3078 }
0x1763   :  { %2376 = vrot.lane.b32.xlu0 %v3079_v28, %s3096_s26 }
0x17d5   :  { %v2377_v31 = vpop.permute.xlu0 %2376 }
0x17d6   :  { %v2379_v32 = vmul.f32 %v3077_v46, %v2377_v31 }
0x17d8   :  { %2392 = vrot.lane.b32.xlu1 %v2379_v32, %s3097_s27 }
0x184a   :  { %v2393_v47 = vpop.permute.xlu1 %2392 }
0x184b   :  { %2946 = vmatmul.mubr.msk.f32.vlgmr.msra.gmra.mxu0 %vm201_vm2, %v2393_v47 }
0x190b   :  { %v2462_v36 = vpop.f32.mrf.mxu0 }
0x190c   :  { %v2463_v37 = vadd.f32 %v2520_v35, %v2462_v36 }
0x190d   :  { %v2947_v38 = vpop.f32.mrf.mxu0 }
0x190e   :  { %2467 = vst.msk [vmem:[%s3734_s9] sm:$0xff] %vm2466_vm3, %v2463_v37 }

</bundles_post_ra>
